<compile_context>
chip_gen: v7x
topology: tpu7x:2x2x1
jax: 0.10.0
libtpu: 0.0.40
codegen_flags: <defaults>
</compile_context>

<pallas_src>
import functools

import jax
import jax.numpy as jnp
from jax.experimental import pallas as pl
from jax.experimental.pallas import tpu as pltpu


def _round_up(n, m):
    return ((n + m - 1) // m) * m


def _cdiv(a, b):
    return (a + b - 1) // b


def _choose_tile(rows, max_tile):
    """Pick a batch tile (in packed-row units).

    Single block if it fits; otherwise a multiple of 8, with an even grid of
    >= 4 steps (v7x: 2 TensorCores x >=2 pipelined steps each) and balanced so
    last-block waste is bounded.
    """
    max_tile = max(8, _round_up(max_tile, 8))
    if rows <= max_tile:
        return rows                      # one (possibly ragged) block
    n_steps = _cdiv(rows, max_tile)
    n_steps = max(4, n_steps + (n_steps % 2))
    return max(8, _round_up(_cdiv(rows, n_steps), 8))


def _block_diag_p(w, P):
    """P copies of w on the block diagonal (P=1 -> w unchanged)."""
    if P == 1:
        return w
    din, dout = w.shape
    out = jnp.zeros((P * din, P * dout), w.dtype)
    for p in range(P):
        out = out.at[p * din:(p + 1) * din, p * dout:(p + 1) * dout].set(w)
    return out


def _make_kernel(e1p, e2p, latp, outp):
    """Fused forward for one packed batch tile (widths are Python ints)."""

    def kernel(x_ref, w1, w2, w34, w5, w3, w6, bias_ref, recon_ref, lat_ref):
        f32 = jnp.float32
        bf16 = jnp.bfloat16

        bias = bias_ref[...]             # (8, >=128) f32, loaded once per tile
        b1 = bias[0:1, :e1p]
        b2 = bias[1:2, :e2p]
        b34 = bias[2:3, :e2p]
        b5 = bias[3:4, :e1p]
        b6 = bias[4:5, :outp]
        b3 = bias[5:6, :latp]

        # ---- encoder: Linear -> Tanh -> Linear -> Tanh ----
        x = x_ref[...].astype(bf16)
        h = jnp.tanh(jnp.dot(x, w1[...], preferred_element_type=f32) + b1)
        h = jnp.tanh(jnp.dot(h.astype(bf16), w2[...],
                             preferred_element_type=f32) + b2)
        hb = h.astype(bf16)

        # latent head (output only; the decoder consumes the fused w34 path)
        lat_ref[...] = (jnp.dot(hb, w3[...], preferred_element_type=f32)
                        + b3).astype(lat_ref.dtype)

        # ---- decoder (latent layer fused into w34): Tanh -> Linear -> Tanh -> Linear
        d = jnp.tanh(jnp.dot(hb, w34[...], preferred_element_type=f32) + b34)
        d = jnp.tanh(jnp.dot(d.astype(bf16), w5[...],
                             preferred_element_type=f32) + b5)
        recon_ref[...] = (jnp.dot(d.astype(bf16), w6[...],
                                  preferred_element_type=f32)
                          + b6).astype(recon_ref.dtype)

    return kernel


def init_autoencoder_params(key, input_dim, output_dim, latent_dim=2,
                            hidden_dims=(16, 8), dtype=jnp.float32):
    """Parameter init mirroring the nn.Linear shapes (W stored as (in, out))."""
    dims_enc = [input_dim] + list(hidden_dims) + [latent_dim]
    dims_dec = [latent_dim] + list(reversed(hidden_dims)) + [output_dim]

    params = []
    for d_in, d_out in list(zip(dims_enc[:-1], dims_enc[1:])) + \
                       list(zip(dims_dec[:-1], dims_dec[1:])):
        key, kw, kb = jax.random.split(key, 3)
        bound = 1.0 / jnp.sqrt(d_in)
        w = jax.random.uniform(kw, (d_in, d_out), dtype, -bound, bound)
        b = jax.random.uniform(kb, (1, d_out), dtype, -bound, bound)
        params.extend([w, b])
    return params  # [w1,b1, w2,b2, w3,b3, w4,b4, w5,b5, w6,b6]


def _pack_params(params, P):
    """Fuse w3@w4, cast weights to bf16, 4x block-diag them, fold biases."""
    w1, b1, w2, b2, w3, b3, w4, b4, w5, b5, w6, b6 = params
    bf16 = jnp.bfloat16
    hi = jax.lax.Precision.HIGHEST

    # Latent has no nonlinearity -> fuse it into the first decoder layer.
    w34 = jnp.dot(w3, w4, precision=hi)                 # (h2, h2)
    b34 = jnp.dot(b3, w4, precision=hi) + b4            # (1, h2)

    weights = [_block_diag_p(w.astype(bf16), P)
               for w in (w1, w2, w34, w5, w3, w6)]

    brows = [jnp.tile(b.astype(jnp.float32), (1, P))
             for b in (b1, b2, b34, b5, b6, b3)]
    wb = _round_up(max(128, max(r.shape[1] for r in brows)), 128)
    bias_blk = jnp.zeros((8, wb), jnp.float32)
    for i, r in enumerate(brows):
        bias_blk = bias_blk.at[i, :r.shape[1]].set(r[0])
    return weights, bias_blk


@functools.partial(jax.jit, static_argnames=("tile_b",))
def autoencoder_forward(x, params, tile_b=1024):
    """x: [B, input_dim] -> (reconstructed [B, output_dim], latent [B, latent_dim])."""
    B, input_dim = x.shape
    h1 = params[1].shape[1]
    h2 = params[3].shape[1]
    latent_dim = params[5].shape[1]   # b3 is (1, latent_dim)
    output_dim = params[11].shape[1]  # b6 is (1, output_dim)

    # Row-packing factor: P logical rows per physical row so the recon store is
    # lane-dense (P*output_dim lanes) and elementwise/MXU work is dense.
    P = max(1, 128 // max(input_dim, output_dim))

    weights, bias_blk = _pack_params(params, P)
    inp, outp, latp = P * input_dim, P * output_dim, P * latent_dim
    e1p, e2p = P * h1, P * h2

    # Pad batch only to a multiple of P (usually a no-op), then view packed.
    B_p = _round_up(B, P)
    if B_p != B:
        x = jnp.pad(x, ((0, B_p - B), (0, 0)))
    rows = B_p // P
    x_packed = x.reshape(rows, inp)          # free, contiguous

    tile = _choose_tile(rows, max(1, tile_b // P))
    grid = (_cdiv(rows, tile),)              # ragged last block clipped by Pallas

    kernel = _make_kernel(e1p, e2p, latp, outp)

    def const_spec(a):
        return pl.BlockSpec(a.shape, lambda i: (0, 0))

    recon_p, lat_p = pl.pallas_call(
        kernel,
        out_shape=(jax.ShapeDtypeStruct((rows, outp), x.dtype),
                   jax.ShapeDtypeStruct((rows, latp), x.dtype)),
        grid_spec=pltpu.PrefetchScalarGridSpec(
            num_scalar_prefetch=0,
            grid=grid,
            in_specs=[pl.BlockSpec((tile, inp), lambda i: (i, 0))]
                     + [const_spec(w) for w in weights]
                     + [const_spec(bias_blk)],
            out_specs=[pl.BlockSpec((tile, outp), lambda i: (i, 0)),
                       pl.BlockSpec((tile, latp), lambda i: (i, 0))],
        ),
        compiler_params=pltpu.CompilerParams(
            dimension_semantics=("parallel",)),
    )(x_packed, *weights, bias_blk)

    recon = recon_p.reshape(B_p, output_dim)[:B]
    latent = lat_p.reshape(B_p, latent_dim)[:B]
    return recon, latent


def _reference_f32(x, params):
    """Plain-JAX f32 reference of the original (unfused) module math."""
    w1, b1, w2, b2, w3, b3, w4, b4, w5, b5, w6, b6 = params
    h = jnp.tanh(x @ w1 + b1)
    h = jnp.tanh(h @ w2 + b2)
    z = h @ w3 + b3
    d = jnp.tanh(z @ w4 + b4)
    d = jnp.tanh(d @ w5 + b5)
    return d @ w6 + b6, z


def _reference_kernel_math(x, params):
    """Mirrors the kernel: bf16 weights, f32 accum/tanh, fused latent->decoder."""
    w1, b1, w2, b2, w3, b3, w4, b4, w5, b5, w6, b6 = params
    bf = jnp.bfloat16
    hi = jax.lax.Precision.HIGHEST
    w34 = jnp.dot(w3, w4, precision=hi).astype(bf)
    b34 = jnp.dot(b3, w4, precision=hi) + b4

    def lin(a, w, b):
        return jnp.dot(a.astype(bf), w.astype(bf),
                       preferred_element_type=jnp.float32) + b

    h = jnp.tanh(lin(x, w1, b1))
    h = jnp.tanh(lin(h, w2, b2))
    z = lin(h, w3, b3)
    d = jnp.tanh(jnp.dot(h.astype(bf), w34,
                         preferred_element_type=jnp.float32) + b34)
    d = jnp.tanh(lin(d, w5, b5))
    return lin(d, w6, b6), z


if __name__ == "__main__":
    input_dim = 32
    output_dim = 32
    latent_dim = 2
    hidden_dims = (16, 8)

    key = jax.random.PRNGKey(0)
    key_p, key_x1, key_x2, key_x3 = jax.random.split(key, 4)
    params = init_autoencoder_params(key_p, input_dim, output_dim,
                                     latent_dim, hidden_dims)

    def check(x, tol=2e-3):
        recon, latent = autoencoder_forward(x, params)
        recon = jax.block_until_ready(recon)
        latent = jax.block_until_ready(latent)
        r_ref, z_ref = _reference_kernel_math(x, params)
        r_f32, z_f32 = _reference_f32(x, params)
        assert recon.shape == (x.shape[0], output_dim)
        assert latent.shape == (x.shape[0], latent_dim)
        # Tight check vs. a reference doing the same bf16/fused math...
        assert jnp.allclose(recon, r_ref, atol=tol, rtol=tol)
        assert jnp.allclose(latent, z_ref, atol=tol, rtol=tol)
        # ...and a loose check vs. the original f32 module math.
        assert jnp.allclose(recon, r_f32, atol=1e-1, rtol=1e-1)
        assert jnp.allclose(latent, z_f32, atol=1e-1, rtol=1e-1)

    # Case 1: perf-representative batch -> 4 grid steps of 256 packed rows
    #         (even grid so v7x's 2 TensorCores each pipeline >= 2 steps).
    check(jax.random.normal(key_x1, (4096, input_dim), jnp.float32))
    # Case 2: small batch, B % P == 0 -> single clipped block, no padding.
    check(jax.random.normal(key_x2, (100, input_dim), jnp.float32))
    # Case 3: batch not a multiple of the pack factor (wrapper pads 2 rows).
    check(jax.random.normal(key_x3, (102, input_dim), jnp.float32))

    print("KERNEL_OK")
</pallas_src>

<mosaic_0001>
module attributes {stable_mosaic.version = 11 : i64} {
  func.func @kernel(%arg0: i32, %arg1: memref<256x128xf32, #tpu.memory_space<vmem>>, %arg2: memref<128x64xbf16, #tpu.memory_space<vmem>>, %arg3: memref<64x32xbf16, #tpu.memory_space<vmem>>, %arg4: memref<32x32xbf16, #tpu.memory_space<vmem>>, %arg5: memref<32x64xbf16, #tpu.memory_space<vmem>>, %arg6: memref<32x8xbf16, #tpu.memory_space<vmem>>, %arg7: memref<64x128xbf16, #tpu.memory_space<vmem>>, %arg8: memref<8x128xf32, #tpu.memory_space<vmem>>, %arg9: memref<256x128xf32, #tpu.memory_space<vmem>>, %arg10: memref<256x8xf32, #tpu.memory_space<vmem>>) attributes {dimension_semantics = [#tpu.dimension_semantics<parallel>], iteration_bounds = array<i64: 4>, scalar_prefetch = 0 : i64, scratch_operands = 0 : i64, tpu.core_type = #tpu.core_type<tc>, window_params = [{transform_indices = @transform_0, window_bounds = array<i64: 256, 128>}, {pipeline_mode = #tpu.pipeline_mode<synchronous>, transform_indices = @transform_1, window_bounds = array<i64: 128, 64>}, {pipeline_mode = #tpu.pipeline_mode<synchronous>, transform_indices = @transform_2, window_bounds = array<i64: 64, 32>}, {pipeline_mode = #tpu.pipeline_mode<synchronous>, transform_indices = @transform_3, window_bounds = array<i64: 32, 32>}, {pipeline_mode = #tpu.pipeline_mode<synchronous>, transform_indices = @transform_4, window_bounds = array<i64: 32, 64>}, {pipeline_mode = #tpu.pipeline_mode<synchronous>, transform_indices = @transform_5, window_bounds = array<i64: 32, 8>}, {pipeline_mode = #tpu.pipeline_mode<synchronous>, transform_indices = @transform_6, window_bounds = array<i64: 64, 128>}, {pipeline_mode = #tpu.pipeline_mode<synchronous>, transform_indices = @transform_7, window_bounds = array<i64: 8, 128>}, {transform_indices = @transform_8, window_bounds = array<i64: 256, 128>}, {transform_indices = @transform_9, window_bounds = array<i64: 256, 8>}]} {
    %c0 = arith.constant 0 : index
    %c0_0 = arith.constant 0 : index
    %0 = vector.load %arg8[%c0, %c0_0] : memref<8x128xf32, #tpu.memory_space<vmem>>, vector<8x128xf32>
    %1 = vector.extract_strided_slice %0 {offsets = [0, 0], sizes = [1, 64], strides = [1, 1]} : vector<8x128xf32> to vector<1x64xf32>
    %2 = vector.extract_strided_slice %0 {offsets = [1, 0], sizes = [1, 32], strides = [1, 1]} : vector<8x128xf32> to vector<1x32xf32>
    %3 = vector.extract_strided_slice %0 {offsets = [2, 0], sizes = [1, 32], strides = [1, 1]} : vector<8x128xf32> to vector<1x32xf32>
    %4 = vector.extract_strided_slice %0 {offsets = [3, 0], sizes = [1, 64], strides = [1, 1]} : vector<8x128xf32> to vector<1x64xf32>
    %5 = vector.extract_strided_slice %0 {offsets = [4, 0], sizes = [1, 128], strides = [1, 1]} : vector<8x128xf32> to vector<1x128xf32>
    %6 = vector.extract_strided_slice %0 {offsets = [5, 0], sizes = [1, 8], strides = [1, 1]} : vector<8x128xf32> to vector<1x8xf32>
    %c0_1 = arith.constant 0 : index
    %c0_2 = arith.constant 0 : index
    %7 = vector.load %arg1[%c0_1, %c0_2] : memref<256x128xf32, #tpu.memory_space<vmem>>, vector<256x128xf32>
    %8 = arith.truncf %7 : vector<256x128xf32> to vector<256x128xbf16>
    %c0_3 = arith.constant 0 : index
    %c0_4 = arith.constant 0 : index
    %9 = vector.load %arg2[%c0_3, %c0_4] : memref<128x64xbf16, #tpu.memory_space<vmem>>, vector<128x64xbf16>
    %cst = arith.constant dense<0.000000e+00> : vector<256x64xf32>
    %10 = tpu.matmul %8, %9, %cst {dimension_numbers = #tpu.dot_dimension_numbers<[1], [0], [0], [1], [0, 0, 1, 1], [], []>} : vector<256x128xbf16>, vector<128x64xbf16>, vector<256x64xf32> -> vector<256x64xf32>
    %11 = vector.broadcast %1 : vector<1x64xf32> to vector<256x64xf32>
    %12 = arith.addf %10, %11 : vector<256x64xf32>
    %13 = math.tanh %12 : vector<256x64xf32>
    %14 = arith.truncf %13 : vector<256x64xf32> to vector<256x64xbf16>
    %c0_5 = arith.constant 0 : index
    %c0_6 = arith.constant 0 : index
    %15 = vector.load %arg3[%c0_5, %c0_6] : memref<64x32xbf16, #tpu.memory_space<vmem>>, vector<64x32xbf16>
    %cst_7 = arith.constant dense<0.000000e+00> : vector<256x32xf32>
    %16 = tpu.matmul %14, %15, %cst_7 {dimension_numbers = #tpu.dot_dimension_numbers<[1], [0], [0], [1], [0, 0, 1, 1], [], []>} : vector<256x64xbf16>, vector<64x32xbf16>, vector<256x32xf32> -> vector<256x32xf32>
    %17 = vector.broadcast %2 : vector<1x32xf32> to vector<256x32xf32>
    %18 = arith.addf %16, %17 : vector<256x32xf32>
    %19 = math.tanh %18 : vector<256x32xf32>
    %20 = arith.truncf %19 : vector<256x32xf32> to vector<256x32xbf16>
    %c0_8 = arith.constant 0 : index
    %c0_9 = arith.constant 0 : index
    %21 = vector.load %arg6[%c0_8, %c0_9] : memref<32x8xbf16, #tpu.memory_space<vmem>>, vector<32x8xbf16>
    %cst_10 = arith.constant dense<0.000000e+00> : vector<256x8xf32>
    %22 = tpu.matmul %20, %21, %cst_10 {dimension_numbers = #tpu.dot_dimension_numbers<[1], [0], [0], [1], [0, 0, 1, 1], [], []>} : vector<256x32xbf16>, vector<32x8xbf16>, vector<256x8xf32> -> vector<256x8xf32>
    %23 = vector.broadcast %6 : vector<1x8xf32> to vector<256x8xf32>
    %24 = arith.addf %22, %23 : vector<256x8xf32>
    %c0_11 = arith.constant 0 : index
    %c0_12 = arith.constant 0 : index
    %25 = vector.load %arg10[%c0_11, %c0_12] : memref<256x8xf32, #tpu.memory_space<vmem>>, vector<256x8xf32>
    tpu.vector_store %arg10[%c0_11, %c0_12], %24 {strides = array<i32>} : memref<256x8xf32, #tpu.memory_space<vmem>>, vector<256x8xf32>,
    %c0_13 = arith.constant 0 : index
    %c0_14 = arith.constant 0 : index
    %26 = vector.load %arg4[%c0_13, %c0_14] : memref<32x32xbf16, #tpu.memory_space<vmem>>, vector<32x32xbf16>
    %cst_15 = arith.constant dense<0.000000e+00> : vector<256x32xf32>
    %27 = tpu.matmul %20, %26, %cst_15 {dimension_numbers = #tpu.dot_dimension_numbers<[1], [0], [0], [1], [0, 0, 1, 1], [], []>} : vector<256x32xbf16>, vector<32x32xbf16>, vector<256x32xf32> -> vector<256x32xf32>
    %28 = vector.broadcast %3 : vector<1x32xf32> to vector<256x32xf32>
    %29 = arith.addf %27, %28 : vector<256x32xf32>
    %30 = math.tanh %29 : vector<256x32xf32>
    %31 = arith.truncf %30 : vector<256x32xf32> to vector<256x32xbf16>
    %c0_16 = arith.constant 0 : index
    %c0_17 = arith.constant 0 : index
    %32 = vector.load %arg5[%c0_16, %c0_17] : memref<32x64xbf16, #tpu.memory_space<vmem>>, vector<32x64xbf16>
    %cst_18 = arith.constant dense<0.000000e+00> : vector<256x64xf32>
    %33 = tpu.matmul %31, %32, %cst_18 {dimension_numbers = #tpu.dot_dimension_numbers<[1], [0], [0], [1], [0, 0, 1, 1], [], []>} : vector<256x32xbf16>, vector<32x64xbf16>, vector<256x64xf32> -> vector<256x64xf32>
    %34 = vector.broadcast %4 : vector<1x64xf32> to vector<256x64xf32>
    %35 = arith.addf %33, %34 : vector<256x64xf32>
    %36 = math.tanh %35 : vector<256x64xf32>
    %37 = arith.truncf %36 : vector<256x64xf32> to vector<256x64xbf16>
    %c0_19 = arith.constant 0 : index
    %c0_20 = arith.constant 0 : index
    %38 = vector.load %arg7[%c0_19, %c0_20] : memref<64x128xbf16, #tpu.memory_space<vmem>>, vector<64x128xbf16>
    %cst_21 = arith.constant dense<0.000000e+00> : vector<256x128xf32>
    %39 = tpu.matmul %37, %38, %cst_21 {dimension_numbers = #tpu.dot_dimension_numbers<[1], [0], [0], [1], [0, 0, 1, 1], [], []>} : vector<256x64xbf16>, vector<64x128xbf16>, vector<256x128xf32> -> vector<256x128xf32>
    %40 = vector.broadcast %5 : vector<1x128xf32> to vector<256x128xf32>
    %41 = arith.addf %39, %40 : vector<256x128xf32>
    %c0_22 = arith.constant 0 : index
    %c0_23 = arith.constant 0 : index
    %42 = vector.load %arg9[%c0_22, %c0_23] : memref<256x128xf32, #tpu.memory_space<vmem>>, vector<256x128xf32>
    tpu.vector_store %arg9[%c0_22, %c0_23], %41 {strides = array<i32>} : memref<256x128xf32, #tpu.memory_space<vmem>>, vector<256x128xf32>,
    return
  }
  func.func @transform_0(%arg0: i32) -> (i32, i32) {
    %c0_i32 = arith.constant 0 : i32
    %c0_i32_0 = arith.constant 0 : i32
    return %arg0, %c0_i32 : i32, i32
  }
  func.func @transform_1(%arg0: i32) -> (i32, i32) {
    %c0_i32 = arith.constant 0 : i32
    %c0_i32_0 = arith.constant 0 : i32
    %c0_i32_1 = arith.constant 0 : i32
    return %c0_i32, %c0_i32_0 : i32, i32
  }
  func.func @transform_2(%arg0: i32) -> (i32, i32) {
    %c0_i32 = arith.constant 0 : i32
    %c0_i32_0 = arith.constant 0 : i32
    %c0_i32_1 = arith.constant 0 : i32
    return %c0_i32, %c0_i32_0 : i32, i32
  }
  func.func @transform_3(%arg0: i32) -> (i32, i32) {
    %c0_i32 = arith.constant 0 : i32
    %c0_i32_0 = arith.constant 0 : i32
    %c0_i32_1 = arith.constant 0 : i32
    return %c0_i32, %c0_i32_0 : i32, i32
  }
  func.func @transform_4(%arg0: i32) -> (i32, i32) {
    %c0_i32 = arith.constant 0 : i32
    %c0_i32_0 = arith.constant 0 : i32
    %c0_i32_1 = arith.constant 0 : i32
    return %c0_i32, %c0_i32_0 : i32, i32
  }
  func.func @transform_5(%arg0: i32) -> (i32, i32) {
    %c0_i32 = arith.constant 0 : i32
    %c0_i32_0 = arith.constant 0 : i32
    %c0_i32_1 = arith.constant 0 : i32
    return %c0_i32, %c0_i32_0 : i32, i32
  }
  func.func @transform_6(%arg0: i32) -> (i32, i32) {
    %c0_i32 = arith.constant 0 : i32
    %c0_i32_0 = arith.constant 0 : i32
    %c0_i32_1 = arith.constant 0 : i32
    return %c0_i32, %c0_i32_0 : i32, i32
  }
  func.func @transform_7(%arg0: i32) -> (i32, i32) {
    %c0_i32 = arith.constant 0 : i32
    %c0_i32_0 = arith.constant 0 : i32
    %c0_i32_1 = arith.constant 0 : i32
    return %c0_i32, %c0_i32_0 : i32, i32
  }
  func.func @transform_8(%arg0: i32) -> (i32, i32) {
    %c0_i32 = arith.constant 0 : i32
    %c0_i32_0 = arith.constant 0 : i32
    return %arg0, %c0_i32 : i32, i32
  }
  func.func @transform_9(%arg0: i32) -> (i32, i32) {
    %c0_i32 = arith.constant 0 : i32
    %c0_i32_0 = arith.constant 0 : i32
    return %arg0, %c0_i32 : i32, i32
  }
}

</mosaic_0001>

<bundles_post_ra>
// kernel: autoencoder_forward.1
= control target key start
LH: loop header
LB: loop body
LE: loop exit
PB: predicated region body
PF: predicated region fallthrough
CT: control target
= control target key end

     0   :  { %s2925_s30 = smov 0   ;;  %s3470_s0 = inlined_call_operand.vmem [shape: f32[1024,128], index: 0, kind: input, shape index: {}]   ;;  %s3471_s1 = inlined_call_operand.vmem [shape: bf16[128,64], index: 1, kind: input, shape index: {}]   ;;  %s3472_s2 = inlined_call_operand.vmem [shape: bf16[64,32], index: 2, kind: input, shape index: {}]   ;;  %s3473_s3 = inlined_call_operand.vmem [shape: bf16[32,32], index: 3, kind: input, shape index: {}]   ;;  %s3474_s4 = inlined_call_operand.vmem [shape: bf16[32,64], index: 4, kind: input, shape index: {}]   ;;  %s3475_s5 = inlined_call_operand.vmem [shape: bf16[32,8], index: 5, kind: input, shape index: {}]   ;;  %s3476_s6 = inlined_call_operand.vmem [shape: bf16[64,128], index: 6, kind: input, shape index: {}]   ;;  %s3477_s7 = inlined_call_operand.vmem [shape: f32[8,128], index: 7, kind: input, shape index: {}]   ;;  %s3478_s8 = inlined_call_operand.vmem [shape: f32[1024,128], index: 8, kind: output, shape index: {0}]   ;;  %s3479_s9 = inlined_call_operand.vmem [shape: f32[1024,8], index: 9, kind: output, shape index: {1}]  }
   0x1 LB: > { %s2107_s10 = sadd.s32 4294967295, %s2873_s30   ;;  %p2111_p0 = scmp.ge.s32.totalorder %s2873_s30, 1  ;;  %s2873_s30 = sphi %s2925_s30, %s20_s30  }
   0x2   : > { %p291_p1 = scmp.lt.s32.totalorder %s2873_s30, 5 }
   0x4   : > { %p292_p2 = pnand %p2111_p0, %p291_p1 }
   0x5   : > { %v2588_v0 = vld [vmem:[%s3471_s1] sm:$0xff] (!%p292_p2)   ;;  %s2112_s13 = sshll.u32 (!%p292_p2), %s2107_s10, 5  ;;  %v2589_v1 = vld [vmem:[%s3471_s1 + $0x8] sm:$0xff] (!%p292_p2)   ;;  %v2590_v2 = vld [vmem:[%s3471_s1 + $0x10] sm:$0xff] (!%p292_p2)   ;;  %v416_v63 = vlaneseq (!%p292_p2)  ;;  %vm713_vm0 = vcmask (!%p292_p2), 523264   ;;  %vm991_vm1 = vcmask (!%p292_p2), 261120  }
   0x6   : > { %295 = sbr.rel (%p292_p2) target bundleno = 1244 (0x4dc), region = 52  ;;  %p333_p3 = scmp.lt.s32.totalorder (!%p292_p2), %s2112_s13, 127  ;;  %2340 = vmatprep.subr.bf16.mxu0 (!%p292_p2), %v2588_v0  ;;  %v2591_v3 = vld [vmem:[%s3471_s1 + $0x18] sm:$0xff] (!%p292_p2)   ;;  %v2592_v7 = vld [vmem:[%s3471_s1 + $0x20] sm:$0xff] (!%p292_p2)   ;;  %v2593_v8 = vld [vmem:[%s3471_s1 + $0x28] sm:$0xff] (!%p292_p2)   ;;  %vm1201_vm2 = vcmask (!%p292_p2), 64512  }
   0x7   : > { %2341 = vmatpush3.bf16.msra.mxu0 (!%p292_p2), %v2588_v0  ;;  %v2594_v9 = vld [vmem:[%s3471_s1 + $0x30] sm:$0xff] (!%p292_p2)   ;;  %v2595_v10 = vld [vmem:[%s3471_s1 + $0x38] sm:$0xff] (!%p292_p2)   ;;  %v2596_v56 = vld [vmem:[%s3472_s2] sm:$0xff] (!%p292_p2)   ;;  %v3026_v0 = vshrl.u32 (!%p292_p2), %v416_v63, 7 }
   0x8   : > { %2342 = vmatprep.subr.bf16.mxu0 (!%p292_p2), %v2589_v1  ;;  %2388 = vmatprep.subr.bf16.mxu1 (!%p292_p2), %v2596_v56  ;;  %v2597_v57 = vld [vmem:[%s3472_s2 + $0x8] sm:$0xff] (!%p292_p2)   ;;  %v2598_v58 = vld [vmem:[%s3472_s2 + $0x10] sm:$0xff] (!%p292_p2)   ;;  %v2599_v59 = vld [vmem:[%s3472_s2 + $0x18] sm:$0xff] (!%p292_p2)  }
   0x9   : > { %2389 = vmatpush3.bf16.msra.mxu1 (!%p292_p2), %v2596_v56  ;;  %v2600_v60 = vld [vmem:[%s3475_s5] sm:$0xff] (!%p292_p2)   ;;  %v3020_v62 = vld [vmem:[%s3473_s3 + $0x8] sm:$0xff] (!%p292_p2)  }
   0xa   : > { %2390 = vmatprep.subr.bf16.mxu1 (!%p292_p2), %v2597_v57  ;;  %v3015_v61 = vld [vmem:[%s3473_s3] sm:$0xff] (!%p292_p2)  }
   0xb   : > { %2343 = vmatpush3.bf16.msra.mxu0 (!%p292_p2), %v2589_v1  ;;  %v418_v1 = vsub.s32 (!%p292_p2), 0, %v3026_v0 }
   0xc   : > { %2344 = vmatprep.subr.bf16.mxu0 (!%p292_p2), %v2590_v2 }
   0xd   : > { %s3481_s13 = smov (!%p333_p3, %s2112_s13), 127  ;;  %2391 = vmatpush3.bf16.msra.mxu1 %v2597_v57 }
   0xe   : > { %s2942_s18 = sshll.u32 %s3481_s13, 3  ;;  %2392 = vmatprep.subr.bf16.mxu1 %v2598_v58 }
   0xf   : > { %s2948_s21 = scalar_lea.vmem %s3470_s0, %s2942_s18  ;;  %2345 = vmatpush3.bf16.msra.mxu0 %v2590_v2  ;;  %v3032_v2 = vld [vmem:[%s3477_s7] sm:$0xff]  ;;  %s3187_s24 = scalar_lea.vmem %s3479_s9, %s2942_s18 }
  0x10   : > { %v352_v4 = vld [vmem:[%s2948_s21] sm:$0xff]  ;;  %v353_v5 = vld [vmem:[%s2948_s21 + $0x8] sm:$0xff]  ;;  %2346 = vmatprep.subr.bf16.mxu0 %v2591_v3  ;;  %v354_v11 = vld [vmem:[%s2948_s21 + $0x10] sm:$0xff]  ;;  %s3401_s11 = scalar_lea.vmem %s3478_s8, %s2942_s18 }
  0x11   : > { %v384_v6 = vpack.c.bf16 %v353_v5, %v352_v4  ;;  %v355_v12 = vld [vmem:[%s2948_s21 + $0x18] sm:$0xff]  ;;  %v356_v13 = vld [vmem:[%s2948_s21 + $0x20] sm:$0xff]  ;;  %v357_v14 = vld [vmem:[%s2948_s21 + $0x28] sm:$0xff]  ;;  %2393 = vmatpush3.bf16.msra.mxu1 %v2598_v58 }
  0x12   : > { %v385_v15 = vpack.c.bf16 %v355_v12, %v354_v11  ;;  %v386_v16 = vpack.c.bf16 %v357_v14, %v356_v13  ;;  %v358_v17 = vld [vmem:[%s2948_s21 + $0x30] sm:$0xff]  ;;  %v359_v18 = vld [vmem:[%s2948_s21 + $0x38] sm:$0xff]  ;;  %v360_v19 = vld [vmem:[%s2948_s21 + $0x40] sm:$0xff]  ;;  %2394 = vmatprep.subr.bf16.mxu1 %v2599_v59 }
  0x13   : > { %2356 = vmatprep.mubr.bf16.mxu0 %v384_v6  ;;  %2347 = vmatpush3.bf16.msra.mxu0 %v2591_v3  ;;  %v361_v20 = vld [vmem:[%s2948_s21 + $0x48] sm:$0xff]  ;;  %v387_v21 = vpack.c.bf16 %v359_v18, %v358_v17  ;;  %v362_v23 = vld [vmem:[%s2948_s21 + $0x50] sm:$0xff]  ;;  %v363_v24 = vld [vmem:[%s2948_s21 + $0x58] sm:$0xff]  ;;  %v3035_v3 = vrot.slane %v3032_v2, %v418_v1 }
  0x14   : > { %2348 = vmatprep.subr.bf16.mxu0 %v2592_v7  ;;  %v388_v22 = vpack.c.bf16 %v361_v20, %v360_v19  ;;  %v364_v25 = vld [vmem:[%s2948_s21 + $0x60] sm:$0xff]  ;;  %v365_v26 = vld [vmem:[%s2948_s21 + $0x68] sm:$0xff]  ;;  %v389_v27 = vpack.c.bf16 %v363_v24, %v362_v23  ;;  %v366_v29 = vld [vmem:[%s2948_s21 + $0x70] sm:$0xff] }
  0x15   : > { %v390_v28 = vpack.c.bf16 %v365_v26, %v364_v25  ;;  %v367_v30 = vld [vmem:[%s2948_s21 + $0x78] sm:$0xff]  ;;  %v368_v31 = vld [vmem:[%s2948_s21 + $0x80] sm:$0xff]  ;;  %v369_v32 = vld [vmem:[%s2948_s21 + $0x88] sm:$0xff]  ;;  %2395 = vmatpush3.bf16.msra.mxu1 %v2599_v59 }
  0x16   : > { %v391_v33 = vpack.c.bf16 %v367_v30, %v366_v29  ;;  %v392_v34 = vpack.c.bf16 %v369_v32, %v368_v31  ;;  %v370_v35 = vld [vmem:[%s2948_s21 + $0x90] sm:$0xff]  ;;  %v371_v36 = vld [vmem:[%s2948_s21 + $0x98] sm:$0xff]  ;;  %v372_v37 = vld [vmem:[%s2948_s21 + $0xa0] sm:$0xff]  ;;  %2428 = vmatprep.subr.bf16.mxu1 %v2600_v60 }
  0x17   : > { %2349 = vmatpush3.bf16.msra.mxu0 %v2592_v7  ;;  %v373_v38 = vld [vmem:[%s2948_s21 + $0xa8] sm:$0xff]  ;;  %v393_v39 = vpack.c.bf16 %v371_v36, %v370_v35  ;;  %v374_v41 = vld [vmem:[%s2948_s21 + $0xb0] sm:$0xff]  ;;  %v375_v42 = vld [vmem:[%s2948_s21 + $0xb8] sm:$0xff] }
  0x18   : > { %2350 = vmatprep.subr.bf16.mxu0 %v2593_v8  ;;  %v394_v40 = vpack.c.bf16 %v373_v38, %v372_v37  ;;  %v376_v43 = vld [vmem:[%s2948_s21 + $0xc0] sm:$0xff]  ;;  %v377_v44 = vld [vmem:[%s2948_s21 + $0xc8] sm:$0xff]  ;;  %v395_v45 = vpack.c.bf16 %v375_v42, %v374_v41  ;;  %v378_v47 = vld [vmem:[%s2948_s21 + $0xd0] sm:$0xff] }
  0x19   : > { %v396_v46 = vpack.c.bf16 %v377_v44, %v376_v43  ;;  %v379_v48 = vld [vmem:[%s2948_s21 + $0xd8] sm:$0xff]  ;;  %v380_v49 = vld [vmem:[%s2948_s21 + $0xe0] sm:$0xff]  ;;  %v381_v50 = vld [vmem:[%s2948_s21 + $0xe8] sm:$0xff] }
  0x1a   : > { %v397_v51 = vpack.c.bf16 %v379_v48, %v378_v47  ;;  %v398_v52 = vpack.c.bf16 %v381_v50, %v380_v49  ;;  %v382_v53 = vld [vmem:[%s2948_s21 + $0xf0] sm:$0xff]  ;;  %v383_v54 = vld [vmem:[%s2948_s21 + $0xf8] sm:$0xff]  ;;  %v2602_v31 = vld [vmem:[%s3475_s5 + $0x8] sm:$0xff]  }
  0x1b   : > { %2351 = vmatpush3.bf16.msra.mxu0 %v2593_v8  ;;  %v399_v55 = vpack.c.bf16 %v383_v54, %v382_v53 }
  0x1c   : > { %2352 = vmatprep.subr.bf16.mxu0 %v2594_v9 }
  0x1f   : > { %2353 = vmatpush3.bf16.msra.mxu0 %v2594_v9 }
  0x20   : > { %2354 = vmatprep.subr.bf16.mxu0 %v2595_v10 }
  0x23   : > { %2355 = vmatpush3.bf16.msra.mxu0 %v2595_v10 }
  0x24   : > { %2464 = vmatprep.subr.bf16.mxu0 %v3015_v61 }
  0x26   : > { %2357 = vmatmul.mubr.bf16.vlgmr.msra.gmra.mrb[0].mxu0 %v385_v15 }
  0x27   : > { %2360 = vmatprep.mubr.bf16.mxu0 %v386_v16  ;;  %2465 = vmatpush3.bf16.msra.mxu0 %v3015_v61 }
  0x28   : > { %2466 = vmatprep.subr.bf16.mxu0 %v3020_v62 }
  0x2b   : > { %2467 = vmatpush3.bf16.msra.mxu0 %v3020_v62 }
  0x2e   : > { %2361 = vmatmul.mubr.bf16.gmra.mrb[4].mxu0 %v387_v21 }
  0x2f   : > { %2364 = vmatprep.mubr.bf16.mxu0 %v388_v22 }
  0x36   : > { %2365 = vmatmul.mubr.bf16.gmra.mrb[8].mxu0 %v389_v27 }
  0x37   : > { %2368 = vmatprep.mubr.bf16.mxu0 %v390_v28 }
  0x3e   : > { %2369 = vmatmul.mubr.bf16.gmra.mrb[12].mxu0 %v391_v33 }
  0x3f   : > { %2372 = vmatprep.mubr.bf16.mxu0 %v392_v34 }
  0x46   : > { %2373 = vmatmul.mubr.bf16.gmra.mrb[16].mxu0 %v393_v39 }
  0x47   : > { %2376 = vmatprep.mubr.bf16.mxu0 %v394_v40 }
  0x4e   : > { %2377 = vmatmul.mubr.bf16.gmra.mrb[20].mxu0 %v395_v45 }
  0x4f   : > { %2380 = vmatprep.mubr.bf16.mxu0 %v396_v46 }
  0x56   : > { %2381 = vmatmul.mubr.bf16.gmra.mrb[24].mxu0 %v397_v51 }
  0x57   : > { %2384 = vmatprep.mubr.bf16.mxu0 %v398_v52 }
  0x5e   : > { %2385 = vmatmul.mubr.bf16.gmra.mrb[28].mxu0 %v399_v55 }
  0xf9   : > { %v2358_v4 = vpop.f32.mrb[0].mxu0 }
  0xfa   : > { %v511_v5 = vadd.f32 %v2358_v4, %v3035_v3  ;;  %v502_v6 = vpop.f32.mrb[1].mxu0 }
  0xfb   : > { %v503_v7 = vadd.f32 %v502_v6, %v3035_v3  ;;  %v2359_v8 = vpop.f32.mrb[2].mxu0 }
  0xfc   : > { %2610 = vtanh.f32 %v511_v5  ;;  %v514_v9 = vadd.f32 %v2359_v8, %v3035_v3  ;;  %v505_v10 = vpop.f32.mrb[3].mxu0 }
  0xfd   : > { %2612 = vtanh.f32 %v503_v7  ;;  %v506_v11 = vadd.f32 %v505_v10, %v3035_v3 }
  0xfe   : > { %2614 = vtanh.f32 %v514_v9 }
  0xff   : > { %2616 = vtanh.f32 %v506_v11 }
 0x101   : > { %v2362_v12 = vpop.f32.mrb[4].mxu0 }
 0x102   : > { %v527_v13 = vadd.f32 %v2362_v12, %v3035_v3  ;;  %v518_v14 = vpop.f32.mrb[5].mxu0 }
 0x103   : > { %v519_v15 = vadd.f32 %v518_v14, %v3035_v3  ;;  %v2363_v16 = vpop.f32.mrb[6].mxu0 }
 0x104   : > { %2618 = vtanh.f32 %v527_v13  ;;  %v530_v17 = vadd.f32 %v2363_v16, %v3035_v3  ;;  %v521_v18 = vpop.f32.mrb[7].mxu0 }
 0x105   : > { %2620 = vtanh.f32 %v519_v15  ;;  %v522_v19 = vadd.f32 %v521_v18, %v3035_v3 }
 0x106   : > { %v2611_v20 = vpop.eup %2610  ;;  %2622 = vtanh.f32 %v530_v17 }
 0x107   : > { %v2613_v21 = vpop.eup %2612  ;;  %2624 = vtanh.f32 %v522_v19 }
 0x108   : > { %v2615_v22 = vpop.eup %2614 }
 0x109   : > { %v2617_v23 = vpop.eup %2616  ;;  %v2366_v24 = vpop.f32.mrb[8].mxu0  ;;  %v662_v25 = vpack.c.bf16 %v2615_v22, %v2611_v20 }
 0x10a   : > { %v543_v26 = vadd.f32 %v2366_v24, %v3035_v3  ;;  %v534_v27 = vpop.f32.mrb[9].mxu0  ;;  %v661_v28 = vpack.c.bf16 %v2617_v23, %v2613_v21 }
 0x10b   : > { %v535_v29 = vadd.f32 %v534_v27, %v3035_v3  ;;  %v2367_v30 = vpop.f32.mrb[10].mxu0 }
 0x10c   : > { %2626 = vtanh.f32 %v543_v26  ;;  %v546_v32 = vadd.f32 %v2367_v30, %v3035_v3  ;;  %v537_v33 = vpop.f32.mrb[11].mxu0  ;;  %2396 = vmatprep.mubr.msk.bf16.mxu1 %vm713_vm0, %v661_v28 }
 0x10d   : > { %2628 = vtanh.f32 %v535_v29  ;;  %v538_v34 = vadd.f32 %v537_v33, %v3035_v3  ;;  %2397 = vmatmul.mubr.msk.bf16.vlgmr.msra.gmra.mrb[0].mxu1 %vm713_vm0, %v662_v25 }
 0x10e   : > { %v2619_v35 = vpop.eup %2618  ;;  %2630 = vtanh.f32 %v546_v32  ;;  %2429 = vmatpush3.bf16.msra.mxu1 %v2600_v60 }
 0x10f   : > { %v2621_v36 = vpop.eup %2620  ;;  %2632 = vtanh.f32 %v538_v34  ;;  %2430 = vmatprep.subr.bf16.mxu1 %v2602_v31 }
 0x110   : > { %v2623_v37 = vpop.eup %2622 }
 0x111   : > { %v2625_v38 = vpop.eup %2624  ;;  %v2370_v39 = vpop.f32.mrb[12].mxu0  ;;  %v664_v40 = vpack.c.bf16 %v2623_v37, %v2619_v35 }
 0x112   : > { %v559_v41 = vadd.f32 %v2370_v39, %v3035_v3  ;;  %v550_v42 = vpop.f32.mrb[13].mxu0  ;;  %v663_v43 = vpack.c.bf16 %v2625_v38, %v2621_v36  ;;  %2431 = vmatpush3.bf16.msra.mxu1 %v2602_v31 }
 0x113   : > { %v551_v44 = vadd.f32 %v550_v42, %v3035_v3  ;;  %v2371_v45 = vpop.f32.mrb[14].mxu0  ;;  %2576 = vmatprep.subr.bf16.mxu1 %v3015_v61 }
 0x114   : > { %2634 = vtanh.f32 %v559_v41  ;;  %v562_v46 = vadd.f32 %v2371_v45, %v3035_v3  ;;  %v553_v47 = vpop.f32.mrb[15].mxu0  ;;  %2400 = vmatprep.mubr.msk.bf16.mxu1 %vm713_vm0, %v663_v43 }
 0x115   : > { %2636 = vtanh.f32 %v551_v44  ;;  %v554_v48 = vadd.f32 %v553_v47, %v3035_v3  ;;  %2401 = vmatmul.mubr.msk.bf16.gmra.mrb[4].mxu1 %vm713_vm0, %v664_v40 }
 0x116   : > { %v2627_v49 = vpop.eup %2626  ;;  %2638 = vtanh.f32 %v562_v46 }
 0x117   : > { %v2629_v50 = vpop.eup %2628  ;;  %2640 = vtanh.f32 %v554_v48 }
 0x118   : > { %v2631_v51 = vpop.eup %2630 }
 0x119   : > { %v2633_v52 = vpop.eup %2632  ;;  %v2374_v53 = vpop.f32.mrb[16].mxu0  ;;  %v666_v54 = vpack.c.bf16 %v2631_v51, %v2627_v49 }
 0x11a   : > { %v575_v55 = vadd.f32 %v2374_v53, %v3035_v3  ;;  %v566_v56 = vpop.f32.mrb[17].mxu0  ;;  %v665_v57 = vpack.c.bf16 %v2633_v52, %v2629_v50 }
 0x11b   : > { %v567_v58 = vadd.f32 %v566_v56, %v3035_v3  ;;  %v2375_v59 = vpop.f32.mrb[18].mxu0 }
 0x11c   : > { %2642 = vtanh.f32 %v575_v55  ;;  %v578_v60 = vadd.f32 %v2375_v59, %v3035_v3  ;;  %v569_v63 = vpop.f32.mrb[19].mxu0  ;;  %2404 = vmatprep.mubr.msk.bf16.mxu1 %vm713_vm0, %v665_v57  ;;  %v687_v57 = vsub.s32 1, %v3026_v0 }
 0x11d   : > { %2644 = vtanh.f32 %v567_v58  ;;  %v570_v1 = vadd.f32 %v569_v63, %v3035_v3  ;;  %2405 = vmatmul.mubr.msk.bf16.gmra.mrb[8].mxu1 %vm713_vm0, %v666_v54 }
 0x11e   : > { %v2635_v4 = vpop.eup %2634  ;;  %2646 = vtanh.f32 %v578_v60  ;;  %v3091_v58 = vrot.slane %v3032_v2, %v687_v57 }
 0x11f   : > { %v2637_v5 = vpop.eup %2636  ;;  %2648 = vtanh.f32 %v570_v1 }
 0x120   : > { %v2639_v6 = vpop.eup %2638 }
 0x121   : > { %v2641_v7 = vpop.eup %2640  ;;  %v2378_v8 = vpop.f32.mrb[20].mxu0  ;;  %v668_v9 = vpack.c.bf16 %v2639_v6, %v2635_v4 }
 0x122   : > { %v591_v10 = vadd.f32 %v2378_v8, %v3035_v3  ;;  %v582_v11 = vpop.f32.mrb[21].mxu0  ;;  %v667_v12 = vpack.c.bf16 %v2641_v7, %v2637_v5 }
 0x123   : > { %v583_v13 = vadd.f32 %v582_v11, %v3035_v3  ;;  %v2379_v14 = vpop.f32.mrb[22].mxu0 }
 0x124   : > { %2650 = vtanh.f32 %v591_v10  ;;  %v594_v15 = vadd.f32 %v2379_v14, %v3035_v3  ;;  %v585_v16 = vpop.f32.mrb[23].mxu0  ;;  %2408 = vmatprep.mubr.msk.bf16.mxu1 %vm713_vm0, %v667_v12 }
 0x125   : > { %2652 = vtanh.f32 %v583_v13  ;;  %v586_v17 = vadd.f32 %v585_v16, %v3035_v3  ;;  %2409 = vmatmul.mubr.msk.bf16.gmra.mrb[12].mxu1 %vm713_vm0, %v668_v9 }
 0x126   : > { %v2643_v18 = vpop.eup %2642  ;;  %2654 = vtanh.f32 %v594_v15 }
 0x127   : > { %v2645_v19 = vpop.eup %2644  ;;  %2656 = vtanh.f32 %v586_v17 }
 0x128   : > { %v2647_v20 = vpop.eup %2646 }
 0x129   : > { %v2649_v21 = vpop.eup %2648  ;;  %v2382_v22 = vpop.f32.mrb[24].mxu0  ;;  %v670_v23 = vpack.c.bf16 %v2647_v20, %v2643_v18 }
 0x12a   : > { %v607_v24 = vadd.f32 %v2382_v22, %v3035_v3  ;;  %v598_v25 = vpop.f32.mrb[25].mxu0  ;;  %v669_v26 = vpack.c.bf16 %v2649_v21, %v2645_v19 }
 0x12b   : > { %v599_v27 = vadd.f32 %v598_v25, %v3035_v3  ;;  %v2383_v28 = vpop.f32.mrb[26].mxu0 }
 0x12c   : > { %2658 = vtanh.f32 %v607_v24  ;;  %v610_v29 = vadd.f32 %v2383_v28, %v3035_v3  ;;  %v601_v30 = vpop.f32.mrb[27].mxu0  ;;  %2412 = vmatprep.mubr.msk.bf16.mxu1 %vm713_vm0, %v669_v26 }
 0x12d   : > { %2660 = vtanh.f32 %v599_v27  ;;  %v602_v31 = vadd.f32 %v601_v30, %v3035_v3  ;;  %2413 = vmatmul.mubr.msk.bf16.gmra.mrb[16].mxu1 %vm713_vm0, %v670_v23 }
 0x12e   : > { %v2651_v32 = vpop.eup %2650  ;;  %2662 = vtanh.f32 %v610_v29 }
 0x12f   : > { %v2653_v33 = vpop.eup %2652  ;;  %2664 = vtanh.f32 %v602_v31 }
 0x130   : > { %v2655_v34 = vpop.eup %2654 }
 0x131   : > { %v2657_v35 = vpop.eup %2656  ;;  %v2386_v36 = vpop.f32.mrb[28].mxu0  ;;  %v672_v37 = vpack.c.bf16 %v2655_v34, %v2651_v32 }
 0x132   : > { %v623_v38 = vadd.f32 %v2386_v36, %v3035_v3  ;;  %v614_v39 = vpop.f32.mrb[29].mxu0  ;;  %v671_v40 = vpack.c.bf16 %v2657_v35, %v2653_v33 }
 0x133   : > { %v615_v41 = vadd.f32 %v614_v39, %v3035_v3  ;;  %v2387_v42 = vpop.f32.mrb[30].mxu0 }
 0x134   : > { %2666 = vtanh.f32 %v623_v38  ;;  %v626_v43 = vadd.f32 %v2387_v42, %v3035_v3  ;;  %v617_v44 = vpop.f32.mrb[31].mxu0  ;;  %2416 = vmatprep.mubr.msk.bf16.mxu1 %vm713_vm0, %v671_v40 }
 0x135   : > { %2668 = vtanh.f32 %v615_v41  ;;  %v618_v45 = vadd.f32 %v617_v44, %v3035_v3  ;;  %2417 = vmatmul.mubr.msk.bf16.gmra.mrb[20].mxu1 %vm713_vm0, %v672_v37 }
 0x136   : > { %v2659_v46 = vpop.eup %2658  ;;  %2670 = vtanh.f32 %v626_v43 }
 0x137   : > { %v2661_v47 = vpop.eup %2660  ;;  %2672 = vtanh.f32 %v618_v45 }
 0x138   : > { %v2663_v48 = vpop.eup %2662 }
 0x139   : > { %v2665_v49 = vpop.eup %2664  ;;  %v674_v50 = vpack.c.bf16 %v2663_v48, %v2659_v46 }
 0x13a   : > { %v673_v51 = vpack.c.bf16 %v2665_v49, %v2661_v47 }
 0x13c   : > { %2420 = vmatprep.mubr.msk.bf16.mxu1 %vm713_vm0, %v673_v51 }
 0x13d   : > { %2421 = vmatmul.mubr.msk.bf16.gmra.mrb[24].mxu1 %vm713_vm0, %v674_v50 }
 0x13e   : > { %v2667_v52 = vpop.eup %2666 }
 0x13f   : > { %v2669_v53 = vpop.eup %2668 }
 0x140   : > { %v2671_v54 = vpop.eup %2670 }
 0x141   : > { %v2673_v55 = vpop.eup %2672  ;;  %v676_v56 = vpack.c.bf16 %v2671_v54, %v2667_v52 }
 0x142   : > { %v675_v3 = vpack.c.bf16 %v2673_v55, %v2669_v53 }
 0x144   : > { %2424 = vmatprep.mubr.msk.bf16.mxu1 %vm713_vm0, %v675_v3 }
 0x145   : > { %2425 = vmatmul.mubr.msk.bf16.gmra.mrb[28].mxu1 %vm713_vm0, %v676_v56 }
 0x1e0   : > { %v2398_v59 = vpop.f32.mrb[0].mxu1 }
 0x1e1   : > { %v805_v60 = vadd.f32 %v2398_v59, %v3091_v58  ;;  %v796_v63 = vpop.f32.mrb[1].mxu1 }
 0x1e2   : > { %v797_v1 = vadd.f32 %v796_v63, %v3091_v58  ;;  %v2399_v4 = vpop.f32.mrb[2].mxu1 }
 0x1e3   : > { %2674 = vtanh.f32 %v805_v60  ;;  %v808_v5 = vadd.f32 %v2399_v4, %v3091_v58  ;;  %v799_v6 = vpop.f32.mrb[3].mxu1 }
 0x1e4   : > { %2676 = vtanh.f32 %v797_v1  ;;  %v800_v7 = vadd.f32 %v799_v6, %v3091_v58 }
 0x1e5   : > { %2678 = vtanh.f32 %v808_v5 }
 0x1e6   : > { %2680 = vtanh.f32 %v800_v7 }
 0x1e8   : > { %v2402_v8 = vpop.f32.mrb[4].mxu1 }
 0x1e9   : > { %v821_v9 = vadd.f32 %v2402_v8, %v3091_v58  ;;  %v812_v10 = vpop.f32.mrb[5].mxu1 }
 0x1ea   : > { %v813_v11 = vadd.f32 %v812_v10, %v3091_v58  ;;  %v2403_v12 = vpop.f32.mrb[6].mxu1 }
 0x1eb   : > { %2682 = vtanh.f32 %v821_v9  ;;  %v824_v13 = vadd.f32 %v2403_v12, %v3091_v58  ;;  %v815_v14 = vpop.f32.mrb[7].mxu1 }
 0x1ec   : > { %2684 = vtanh.f32 %v813_v11  ;;  %v816_v15 = vadd.f32 %v815_v14, %v3091_v58 }
 0x1ed   : > { %v2675_v16 = vpop.eup %2674  ;;  %2686 = vtanh.f32 %v824_v13 }
 0x1ee   : > { %v2677_v17 = vpop.eup %2676  ;;  %2688 = vtanh.f32 %v816_v15 }
 0x1ef   : > { %v2679_v18 = vpop.eup %2678 }
 0x1f0   : > { %v2681_v19 = vpop.eup %2680  ;;  %v956_v20 = vpack.c.bf16 %v2679_v18, %v2675_v16  ;;  %v2406_v21 = vpop.f32.mrb[8].mxu1 }
 0x1f1   : > { %v837_v22 = vadd.f32 %v2406_v21, %v3091_v58  ;;  %v828_v23 = vpop.f32.mrb[9].mxu1  ;;  %v955_v24 = vpack.c.bf16 %v2681_v19, %v2677_v17 }
 0x1f2   : > { %v829_v25 = vadd.f32 %v828_v23, %v3091_v58  ;;  %v2407_v26 = vpop.f32.mrb[10].mxu1 }
 0x1f3   : > { %2690 = vtanh.f32 %v837_v22  ;;  %v840_v27 = vadd.f32 %v2407_v26, %v3091_v58  ;;  %v831_v28 = vpop.f32.mrb[11].mxu1  ;;  %2432 = vmatprep.mubr.msk.bf16.mxu1 %vm991_vm1, %v955_v24  ;;  %2468 = vmatprep.mubr.msk.bf16.mxu0 %vm991_vm1, %v955_v24 }
 0x1f4   : > { %2692 = vtanh.f32 %v829_v25  ;;  %v832_v29 = vadd.f32 %v831_v28, %v3091_v58  ;;  %2433 = vmatmul.mubr.msk.bf16.vlgmr.msra.gmra.mrb[32].mxu1 %vm991_vm1, %v956_v20  ;;  %2469 = vmatmul.mubr.msk.bf16.vlgmr.msra.gmra.mrb[32].mxu0 %vm991_vm1, %v956_v20 }
 0x1f5   : > { %v2683_v30 = vpop.eup %2682  ;;  %2694 = vtanh.f32 %v840_v27  ;;  %2578 = vmatpush3.bf16.msra.mxu1 %v3015_v61 }
 0x1f6   : > { %v2685_v31 = vpop.eup %2684  ;;  %2696 = vtanh.f32 %v832_v29  ;;  %2577 = vmatprep.subr.bf16.mxu1 %v3020_v62 }
 0x1f7   : > { %v2687_v32 = vpop.eup %2686 }
 0x1f8   : > { %v2689_v33 = vpop.eup %2688  ;;  %v2410_v34 = vpop.f32.mrb[12].mxu1  ;;  %v958_v35 = vpack.c.bf16 %v2687_v32, %v2683_v30 }
 0x1f9   : > { %v853_v36 = vadd.f32 %v2410_v34, %v3091_v58  ;;  %v844_v37 = vpop.f32.mrb[13].mxu1  ;;  %v957_v38 = vpack.c.bf16 %v2689_v33, %v2685_v31  ;;  %2579 = vmatpush3.bf16.msra.mxu1 %v3020_v62 }
 0x1fa   : > { %v845_v39 = vadd.f32 %v844_v37, %v3091_v58  ;;  %v2411_v40 = vpop.f32.mrb[14].mxu1 }
 0x1fb   : > { %2698 = vtanh.f32 %v853_v36  ;;  %v856_v61 = vadd.f32 %v2411_v40, %v3091_v58  ;;  %v847_v41 = vpop.f32.mrb[15].mxu1  ;;  %2436 = vmatprep.mubr.msk.bf16.mxu1 %vm991_vm1, %v957_v38  ;;  %2472 = vmatprep.mubr.msk.bf16.mxu0 %vm991_vm1, %v957_v38 }
 0x1fc   : > { %2700 = vtanh.f32 %v845_v39  ;;  %v848_v42 = vadd.f32 %v847_v41, %v3091_v58  ;;  %2437 = vmatmul.mubr.msk.bf16.gmra.mrb[36].mxu1 %vm991_vm1, %v958_v35  ;;  %2473 = vmatmul.mubr.msk.bf16.gmra.mrb[36].mxu0 %vm991_vm1, %v958_v35 }
 0x1fd   : > { %v2691_v43 = vpop.eup %2690  ;;  %2702 = vtanh.f32 %v856_v61 }
 0x1fe   : > { %v2693_v62 = vpop.eup %2692  ;;  %2704 = vtanh.f32 %v848_v42 }
 0x1ff   : > { %v2695_v44 = vpop.eup %2694 }
 0x200   : > { %v2697_v45 = vpop.eup %2696  ;;  %v2414_v46 = vpop.f32.mrb[16].mxu1  ;;  %v960_v47 = vpack.c.bf16 %v2695_v44, %v2691_v43 }
 0x201   : > { %v869_v48 = vadd.f32 %v2414_v46, %v3091_v58  ;;  %v860_v49 = vpop.f32.mrb[17].mxu1  ;;  %v959_v50 = vpack.c.bf16 %v2697_v45, %v2693_v62 }
 0x202   : > { %v861_v51 = vadd.f32 %v860_v49, %v3091_v58  ;;  %v2415_v52 = vpop.f32.mrb[18].mxu1  ;;  %v2605_v49 = vld [vmem:[%s3474_s4 + $0x8] sm:$0xff]  }
 0x203   : > { %2706 = vtanh.f32 %v869_v48  ;;  %v872_v53 = vadd.f32 %v2415_v52, %v3091_v58  ;;  %v863_v54 = vpop.f32.mrb[19].mxu1  ;;  %2440 = vmatprep.mubr.msk.bf16.mxu1 %vm991_vm1, %v959_v50  ;;  %2476 = vmatprep.mubr.msk.bf16.mxu0 %vm991_vm1, %v959_v50  ;;  %v2604_v48 = vld [vmem:[%s3474_s4] sm:$0xff]   ;;  %v2608_v52 = vld [vmem:[%s3476_s6 + $0x10] sm:$0xff]  }
 0x204   : > { %2708 = vtanh.f32 %v861_v51  ;;  %v864_v55 = vadd.f32 %v863_v54, %v3091_v58  ;;  %2441 = vmatmul.mubr.msk.bf16.gmra.mrb[40].mxu1 %vm991_vm1, %v960_v47  ;;  %2477 = vmatmul.mubr.msk.bf16.gmra.mrb[40].mxu0 %vm991_vm1, %v960_v47  ;;  %v2606_v50 = vld [vmem:[%s3476_s6] sm:$0xff]   ;;  %v2607_v51 = vld [vmem:[%s3476_s6 + $0x8] sm:$0xff]   ;;  %v1240_v54 = vsub.s32 2, %v3026_v0 }
 0x205   : > { %v2699_v56 = vpop.eup %2698  ;;  %2710 = vtanh.f32 %v872_v53  ;;  %2500 = vmatprep.subr.bf16.mxu1 %v2604_v48  ;;  %2536 = vmatprep.subr.bf16.mxu0 %v2606_v50  ;;  %v977_v53 = vsub.s32 5, %v3026_v0 }
 0x206   : > { %v2701_v3 = vpop.eup %2700  ;;  %2712 = vtanh.f32 %v864_v55  ;;  %2537 = vmatpush3.bf16.msra.mxu0 %v2606_v50 }
 0x207   : > { %v2703_v57 = vpop.eup %2702  ;;  %2538 = vmatprep.subr.bf16.mxu0 %v2607_v51  ;;  %v3178_v55 = vrot.slane %v3032_v2, %v977_v53 }
 0x208   : > { %v2705_v59 = vpop.eup %2704  ;;  %v2418_v60 = vpop.f32.mrb[20].mxu1  ;;  %v962_v63 = vpack.c.bf16 %v2703_v57, %v2699_v56  ;;  %v3181_v56 = vrot.slane %v3032_v2, %v1240_v54 }
 0x209   : > { %v885_v1 = vadd.f32 %v2418_v60, %v3091_v58  ;;  %v876_v4 = vpop.f32.mrb[21].mxu1  ;;  %v961_v5 = vpack.c.bf16 %v2705_v59, %v2701_v3 }
 0x20a   : > { %v877_v6 = vadd.f32 %v876_v4, %v3091_v58  ;;  %v2419_v7 = vpop.f32.mrb[22].mxu1  ;;  %2539 = vmatpush3.bf16.msra.mxu0 %v2607_v51 }
 0x20b   : > { %2714 = vtanh.f32 %v885_v1  ;;  %v888_v8 = vadd.f32 %v2419_v7, %v3091_v58  ;;  %v879_v9 = vpop.f32.mrb[23].mxu1  ;;  %2444 = vmatprep.mubr.msk.bf16.mxu1 %vm991_vm1, %v961_v5  ;;  %2480 = vmatprep.mubr.msk.bf16.mxu0 %vm991_vm1, %v961_v5 }
 0x20c   : > { %2716 = vtanh.f32 %v877_v6  ;;  %v880_v10 = vadd.f32 %v879_v9, %v3091_v58  ;;  %2445 = vmatmul.mubr.msk.bf16.gmra.mrb[44].mxu1 %vm991_vm1, %v962_v63  ;;  %2481 = vmatmul.mubr.msk.bf16.gmra.mrb[44].mxu0 %vm991_vm1, %v962_v63 }
 0x20d   : > { %v2707_v11 = vpop.eup %2706  ;;  %2718 = vtanh.f32 %v888_v8  ;;  %2540 = vmatprep.subr.bf16.mxu0 %v2608_v52 }
 0x20e   : > { %v2709_v12 = vpop.eup %2708  ;;  %2720 = vtanh.f32 %v880_v10  ;;  %2541 = vmatpush3.bf16.msra.mxu0 %v2608_v52 }
 0x20f   : > { %v2711_v13 = vpop.eup %2710 }
 0x210   : > { %v2713_v14 = vpop.eup %2712  ;;  %v2422_v15 = vpop.f32.mrb[24].mxu1  ;;  %v964_v16 = vpack.c.bf16 %v2711_v13, %v2707_v11 }
 0x211   : > { %v901_v17 = vadd.f32 %v2422_v15, %v3091_v58  ;;  %v892_v18 = vpop.f32.mrb[25].mxu1  ;;  %v963_v19 = vpack.c.bf16 %v2713_v14, %v2709_v12 }
 0x212   : > { %v893_v20 = vadd.f32 %v892_v18, %v3091_v58  ;;  %v2423_v21 = vpop.f32.mrb[26].mxu1 }
 0x213   : > { %2722 = vtanh.f32 %v901_v17  ;;  %v904_v22 = vadd.f32 %v2423_v21, %v3091_v58  ;;  %v895_v23 = vpop.f32.mrb[27].mxu1  ;;  %2448 = vmatprep.mubr.msk.bf16.mxu1 %vm991_vm1, %v963_v19  ;;  %2484 = vmatprep.mubr.msk.bf16.mxu0 %vm991_vm1, %v963_v19 }
 0x214   : > { %2724 = vtanh.f32 %v893_v20  ;;  %v896_v24 = vadd.f32 %v895_v23, %v3091_v58  ;;  %2449 = vmatmul.mubr.msk.bf16.gmra.mrb[48].mxu1 %vm991_vm1, %v964_v16  ;;  %2485 = vmatmul.mubr.msk.bf16.gmra.mrb[48].mxu0 %vm991_vm1, %v964_v16 }
 0x215   : > { %v2715_v25 = vpop.eup %2714  ;;  %2726 = vtanh.f32 %v904_v22 }
 0x216   : > { %v2717_v26 = vpop.eup %2716  ;;  %2728 = vtanh.f32 %v896_v24 }
 0x217   : > { %v2719_v27 = vpop.eup %2718 }
 0x218   : > { %v2721_v28 = vpop.eup %2720  ;;  %v2426_v29 = vpop.f32.mrb[28].mxu1  ;;  %v966_v30 = vpack.c.bf16 %v2719_v27, %v2715_v25 }
 0x219   : > { %v917_v31 = vadd.f32 %v2426_v29, %v3091_v58  ;;  %v908_v32 = vpop.f32.mrb[29].mxu1  ;;  %v965_v33 = vpack.c.bf16 %v2721_v28, %v2717_v26 }
 0x21a   : > { %v909_v34 = vadd.f32 %v908_v32, %v3091_v58  ;;  %v2427_v35 = vpop.f32.mrb[30].mxu1 }
 0x21b   : > { %2730 = vtanh.f32 %v917_v31  ;;  %v920_v36 = vadd.f32 %v2427_v35, %v3091_v58  ;;  %v911_v37 = vpop.f32.mrb[31].mxu1  ;;  %2452 = vmatprep.mubr.msk.bf16.mxu1 %vm991_vm1, %v965_v33  ;;  %2488 = vmatprep.mubr.msk.bf16.mxu0 %vm991_vm1, %v965_v33 }
 0x21c   : > { %2732 = vtanh.f32 %v909_v34  ;;  %v912_v38 = vadd.f32 %v911_v37, %v3091_v58  ;;  %2453 = vmatmul.mubr.msk.bf16.gmra.mrb[52].mxu1 %vm991_vm1, %v966_v30  ;;  %2489 = vmatmul.mubr.msk.bf16.gmra.mrb[52].mxu0 %vm991_vm1, %v966_v30 }
 0x21d   : > { %v2723_v39 = vpop.eup %2722  ;;  %2734 = vtanh.f32 %v920_v36 }
 0x21e   : > { %v2725_v40 = vpop.eup %2724  ;;  %2736 = vtanh.f32 %v912_v38 }
 0x21f   : > { %v2727_v61 = vpop.eup %2726 }
 0x220   : > { %v2729_v41 = vpop.eup %2728  ;;  %v968_v42 = vpack.c.bf16 %v2727_v61, %v2723_v39 }
 0x221   : > { %v967_v43 = vpack.c.bf16 %v2729_v41, %v2725_v40 }
 0x223   : > { %2456 = vmatprep.mubr.msk.bf16.mxu1 %vm991_vm1, %v967_v43  ;;  %2492 = vmatprep.mubr.msk.bf16.mxu0 %vm991_vm1, %v967_v43 }
 0x224   : > { %2457 = vmatmul.mubr.msk.bf16.gmra.mrb[56].mxu1 %vm991_vm1, %v968_v42  ;;  %2493 = vmatmul.mubr.msk.bf16.gmra.mrb[56].mxu0 %vm991_vm1, %v968_v42 }
 0x225   : > { %v2731_v58 = vpop.eup %2730 }
 0x226   : > { %v2733_v62 = vpop.eup %2732 }
 0x227   : > { %v2735_v44 = vpop.eup %2734 }
 0x228   : > { %v2737_v45 = vpop.eup %2736  ;;  %v970_v46 = vpack.c.bf16 %v2735_v44, %v2731_v58 }
 0x229   : > { %v969_v47 = vpack.c.bf16 %v2737_v45, %v2733_v62 }
 0x22b   : > { %2460 = vmatprep.mubr.msk.bf16.mxu1 %vm991_vm1, %v969_v47 }
 0x22c   : > { %2461 = vmatmul.mubr.msk.bf16.gmra.mrb[60].mxu1 %vm991_vm1, %v970_v46 }
 0x22d   : > { %2496 = vmatprep.mubr.msk.bf16.mxu1 %vm991_vm1, %v969_v47 }
 0x234   : > { %2497 = vmatmul.mubr.msk.bf16.vlgmr.msra.gmra.mrb[64].mxu1 %vm991_vm1, %v970_v46 }
 0x235   : > { %2501 = vmatpush3.bf16.msra.mxu1 %v2604_v48 }
 0x236   : > { %2502 = vmatprep.subr.bf16.mxu1 %v2605_v49 }
 0x239   : > { %2503 = vmatpush3.bf16.msra.mxu1 %v2605_v49 }
 0x2c7   : > { %v2434_v3 = vpop.f32.mrb[32].mxu1  ;;  %v2470_v57 = vpop.f32.mrb[32].mxu0 }
 0x2c8   : > { %v1083_v59 = vadd.f32 %v2434_v3, %v3178_v55  ;;  %v1297_v60 = vadd.f32 %v2470_v57, %v3181_v56  ;;  %v1074_v63 = vpop.f32.mrb[33].mxu1  ;;  %v1288_v1 = vpop.f32.mrb[33].mxu0 }
 0x2c9   : > { %v1075_v2 = vadd.f32 %v1074_v63, %v3178_v55  ;;  %v1289_v4 = vadd.f32 %v1288_v1, %v3181_v56  ;;  %v2435_v5 = vpop.f32.mrb[34].mxu1  ;;  %v2471_v6 = vpop.f32.mrb[34].mxu0 }
 0x2ca   : > { %1204 = vst.msk [vmem:[%s3187_s24 + $0x10] sm:$0xff] %vm1201_vm2, %v1083_v59  ;;  %2738 = vtanh.f32 %v1297_v60  ;;  %v1086_v7 = vadd.f32 %v2435_v5, %v3178_v55  ;;  %v1300_v8 = vadd.f32 %v2471_v6, %v3181_v56  ;;  %v1077_v9 = vpop.f32.mrb[35].mxu1  ;;  %v1291_v10 = vpop.f32.mrb[35].mxu0 }
 0x2cb   : > { %1202 = vst.msk [vmem:[%s3187_s24] sm:$0xff] %vm1201_vm2, %v1075_v2  ;;  %2740 = vtanh.f32 %v1289_v4  ;;  %v1078_v11 = vadd.f32 %v1077_v9, %v3178_v55  ;;  %v1292_v12 = vadd.f32 %v1291_v10, %v3181_v56 }
 0x2cc   : > { %1205 = vst.msk [vmem:[%s3187_s24 + $0x18] sm:$0xff] %vm1201_vm2, %v1086_v7  ;;  %2742 = vtanh.f32 %v1300_v8 }
 0x2cd   : > { %1203 = vst.msk [vmem:[%s3187_s24 + $0x8] sm:$0xff] %vm1201_vm2, %v1078_v11  ;;  %2744 = vtanh.f32 %v1292_v12 }
 0x2cf   : > { %v2438_v13 = vpop.f32.mrb[36].mxu1  ;;  %v2474_v14 = vpop.f32.mrb[36].mxu0 }
 0x2d0   : > { %v1099_v15 = vadd.f32 %v2438_v13, %v3178_v55  ;;  %v1313_v16 = vadd.f32 %v2474_v14, %v3181_v56  ;;  %v1090_v17 = vpop.f32.mrb[37].mxu1  ;;  %v1304_v18 = vpop.f32.mrb[37].mxu0 }
 0x2d1   : > { %v1091_v19 = vadd.f32 %v1090_v17, %v3178_v55  ;;  %v1305_v20 = vadd.f32 %v1304_v18, %v3181_v56  ;;  %v2439_v21 = vpop.f32.mrb[38].mxu1  ;;  %v2475_v22 = vpop.f32.mrb[38].mxu0 }
 0x2d2   : > { %1208 = vst.msk [vmem:[%s3187_s24 + $0x30] sm:$0xff] %vm1201_vm2, %v1099_v15  ;;  %2746 = vtanh.f32 %v1313_v16  ;;  %v1102_v23 = vadd.f32 %v2439_v21, %v3178_v55  ;;  %v1316_v24 = vadd.f32 %v2475_v22, %v3181_v56  ;;  %v1093_v25 = vpop.f32.mrb[39].mxu1  ;;  %v1307_v26 = vpop.f32.mrb[39].mxu0 }
 0x2d3   : > { %1206 = vst.msk [vmem:[%s3187_s24 + $0x20] sm:$0xff] %vm1201_vm2, %v1091_v19  ;;  %2748 = vtanh.f32 %v1305_v20  ;;  %v1094_v27 = vadd.f32 %v1093_v25, %v3178_v55  ;;  %v1308_v28 = vadd.f32 %v1307_v26, %v3181_v56 }
 0x2d4   : > { %v2739_v29 = vpop.eup %2738  ;;  %1209 = vst.msk [vmem:[%s3187_s24 + $0x38] sm:$0xff] %vm1201_vm2, %v1102_v23  ;;  %2750 = vtanh.f32 %v1316_v24 }
 0x2d5   : > { %v2741_v30 = vpop.eup %2740  ;;  %1207 = vst.msk [vmem:[%s3187_s24 + $0x28] sm:$0xff] %vm1201_vm2, %v1094_v27  ;;  %2752 = vtanh.f32 %v1308_v28 }
 0x2d6   : > { %v2743_v31 = vpop.eup %2742 }
 0x2d7   : > { %v2745_v32 = vpop.eup %2744  ;;  %v2442_v33 = vpop.f32.mrb[40].mxu1  ;;  %v1448_v35 = vpack.c.bf16 %v2743_v31, %v2739_v29 }
 0x2d8   : > { %v2478_v34 = vpop.f32.mrb[40].mxu0  ;;  %v1115_v36 = vadd.f32 %v2442_v33, %v3178_v55  ;;  %v1106_v38 = vpop.f32.mrb[41].mxu1  ;;  %v1447_v40 = vpack.c.bf16 %v2745_v32, %v2741_v30 }
 0x2d9   : > { %v1329_v37 = vadd.f32 %v2478_v34, %v3181_v56  ;;  %v1320_v39 = vpop.f32.mrb[41].mxu0  ;;  %v1107_v61 = vadd.f32 %v1106_v38, %v3178_v55  ;;  %v2443_v42 = vpop.f32.mrb[42].mxu1 }
 0x2da   : > { %v1321_v41 = vadd.f32 %v1320_v39, %v3181_v56  ;;  %v2479_v43 = vpop.f32.mrb[42].mxu0  ;;  %1212 = vst.msk [vmem:[%s3187_s24 + $0x50] sm:$0xff] %vm1201_vm2, %v1115_v36  ;;  %v1118_v58 = vadd.f32 %v2443_v42, %v3178_v55  ;;  %v1109_v44 = vpop.f32.mrb[43].mxu1  ;;  %2504 = vmatprep.mubr.msk.bf16.mxu1 %vm991_vm1, %v1447_v40 }
 0x2db   : > { %2754 = vtanh.f32 %v1329_v37  ;;  %v1332_v62 = vadd.f32 %v2479_v43, %v3181_v56  ;;  %v1323_v45 = vpop.f32.mrb[43].mxu0  ;;  %1210 = vst.msk [vmem:[%s3187_s24 + $0x40] sm:$0xff] %vm1201_vm2, %v1107_v61  ;;  %v1110_v46 = vadd.f32 %v1109_v44, %v3178_v55  ;;  %2505 = vmatmul.mubr.msk.bf16.vlgmr.msra.gmra.mrb[68].mxu1 %vm991_vm1, %v1448_v35 }
 0x2dc   : > { %2756 = vtanh.f32 %v1321_v41  ;;  %v1324_v47 = vadd.f32 %v1323_v45, %v3181_v56  ;;  %v2747_v48 = vpop.eup %2746  ;;  %1213 = vst.msk [vmem:[%s3187_s24 + $0x58] sm:$0xff] %vm1201_vm2, %v1118_v58 }
 0x2dd   : > { %2758 = vtanh.f32 %v1332_v62  ;;  %v2749_v49 = vpop.eup %2748  ;;  %1211 = vst.msk [vmem:[%s3187_s24 + $0x48] sm:$0xff] %vm1201_vm2, %v1110_v46 }
 0x2de   : > { %2760 = vtanh.f32 %v1324_v47  ;;  %v2751_v50 = vpop.eup %2750 }
 0x2df   : > { %v2753_v51 = vpop.eup %2752  ;;  %v2446_v52 = vpop.f32.mrb[44].mxu1  ;;  %v1450_v54 = vpack.c.bf16 %v2751_v50, %v2747_v48 }
 0x2e0   : > { %v2482_v53 = vpop.f32.mrb[44].mxu0  ;;  %v1131_v3 = vadd.f32 %v2446_v52, %v3178_v55  ;;  %v1122_v59 = vpop.f32.mrb[45].mxu1  ;;  %v1449_v63 = vpack.c.bf16 %v2753_v51, %v2749_v49 }
 0x2e1   : > { %v1345_v57 = vadd.f32 %v2482_v53, %v3181_v56  ;;  %v1336_v60 = vpop.f32.mrb[45].mxu0  ;;  %v1123_v1 = vadd.f32 %v1122_v59, %v3178_v55  ;;  %v2447_v4 = vpop.f32.mrb[46].mxu1 }
 0x2e2   : > { %v1337_v2 = vadd.f32 %v1336_v60, %v3181_v56  ;;  %v2483_v5 = vpop.f32.mrb[46].mxu0  ;;  %1216 = vst.msk [vmem:[%s3187_s24 + $0x70] sm:$0xff] %vm1201_vm2, %v1131_v3  ;;  %v1134_v6 = vadd.f32 %v2447_v4, %v3178_v55  ;;  %v1125_v8 = vpop.f32.mrb[47].mxu1  ;;  %2508 = vmatprep.mubr.msk.bf16.mxu1 %vm991_vm1, %v1449_v63 }
 0x2e3   : > { %2762 = vtanh.f32 %v1345_v57  ;;  %v1348_v7 = vadd.f32 %v2483_v5, %v3181_v56  ;;  %v1339_v9 = vpop.f32.mrb[47].mxu0  ;;  %1214 = vst.msk [vmem:[%s3187_s24 + $0x60] sm:$0xff] %vm1201_vm2, %v1123_v1  ;;  %v1126_v10 = vadd.f32 %v1125_v8, %v3178_v55  ;;  %2509 = vmatmul.mubr.msk.bf16.gmra.mrb[72].mxu1 %vm991_vm1, %v1450_v54 }
 0x2e4   : > { %2764 = vtanh.f32 %v1337_v2  ;;  %v1340_v11 = vadd.f32 %v1339_v9, %v3181_v56  ;;  %1217 = vst.msk [vmem:[%s3187_s24 + $0x78] sm:$0xff] %vm1201_vm2, %v1134_v6 }
 0x2e5   : > { %v2755_v12 = vpop.eup %2754  ;;  %2766 = vtanh.f32 %v1348_v7  ;;  %1215 = vst.msk [vmem:[%s3187_s24 + $0x68] sm:$0xff] %vm1201_vm2, %v1126_v10 }
 0x2e6   : > { %v2757_v13 = vpop.eup %2756  ;;  %2768 = vtanh.f32 %v1340_v11 }
 0x2e7   : > { %v2759_v14 = vpop.eup %2758  ;;  %v2450_v16 = vpop.f32.mrb[48].mxu1 }
 0x2e8   : > { %v2761_v15 = vpop.eup %2760  ;;  %v2486_v17 = vpop.f32.mrb[48].mxu0  ;;  %v1452_v18 = vpack.c.bf16 %v2759_v14, %v2755_v12  ;;  %v1147_v19 = vadd.f32 %v2450_v16, %v3178_v55 }
 0x2e9   : > { %v1361_v20 = vadd.f32 %v2486_v17, %v3181_v56  ;;  %v1138_v21 = vpop.f32.mrb[49].mxu1  ;;  %v1352_v22 = vpop.f32.mrb[49].mxu0  ;;  %v1451_v23 = vpack.c.bf16 %v2761_v15, %v2757_v13 }
 0x2ea   : > { %v1139_v24 = vadd.f32 %v1138_v21, %v3178_v55  ;;  %v1353_v25 = vadd.f32 %v1352_v22, %v3181_v56  ;;  %v2451_v26 = vpop.f32.mrb[50].mxu1  ;;  %v2487_v27 = vpop.f32.mrb[50].mxu0  ;;  %1220 = vst.msk [vmem:[%s3187_s24 + $0x90] sm:$0xff] %vm1201_vm2, %v1147_v19 }
 0x2eb   : > { %2770 = vtanh.f32 %v1361_v20  ;;  %v1150_v28 = vadd.f32 %v2451_v26, %v3178_v55  ;;  %v1364_v29 = vadd.f32 %v2487_v27, %v3181_v56  ;;  %v1141_v30 = vpop.f32.mrb[51].mxu1  ;;  %v1355_v31 = vpop.f32.mrb[51].mxu0  ;;  %2512 = vmatprep.mubr.msk.bf16.mxu1 %vm991_vm1, %v1451_v23 }
 0x2ec   : > { %1218 = vst.msk [vmem:[%s3187_s24 + $0x80] sm:$0xff] %vm1201_vm2, %v1139_v24  ;;  %2772 = vtanh.f32 %v1353_v25  ;;  %v1142_v32 = vadd.f32 %v1141_v30, %v3178_v55  ;;  %v1356_v33 = vadd.f32 %v1355_v31, %v3181_v56  ;;  %2513 = vmatmul.mubr.msk.bf16.gmra.mrb[76].mxu1 %vm991_vm1, %v1452_v18 }
 0x2ed   : > { %v2763_v34 = vpop.eup %2762  ;;  %1221 = vst.msk [vmem:[%s3187_s24 + $0x98] sm:$0xff] %vm1201_vm2, %v1150_v28  ;;  %2774 = vtanh.f32 %v1364_v29 }
 0x2ee   : > { %v2765_v35 = vpop.eup %2764  ;;  %1219 = vst.msk [vmem:[%s3187_s24 + $0x88] sm:$0xff] %vm1201_vm2, %v1142_v32  ;;  %2776 = vtanh.f32 %v1356_v33 }
 0x2ef   : > { %v2767_v36 = vpop.eup %2766  ;;  %v2454_v38 = vpop.f32.mrb[52].mxu1 }
 0x2f0   : > { %v2769_v37 = vpop.eup %2768  ;;  %v2490_v39 = vpop.f32.mrb[52].mxu0  ;;  %v1454_v40 = vpack.c.bf16 %v2767_v36, %v2763_v34  ;;  %v1163_v61 = vadd.f32 %v2454_v38, %v3178_v55 }
 0x2f1   : > { %v1377_v41 = vadd.f32 %v2490_v39, %v3181_v56  ;;  %v1154_v42 = vpop.f32.mrb[53].mxu1  ;;  %v1368_v43 = vpop.f32.mrb[53].mxu0  ;;  %v1453_v58 = vpack.c.bf16 %v2769_v37, %v2765_v35 }
 0x2f2   : > { %v1155_v62 = vadd.f32 %v1154_v42, %v3178_v55  ;;  %v1369_v44 = vadd.f32 %v1368_v43, %v3181_v56  ;;  %v2455_v45 = vpop.f32.mrb[54].mxu1  ;;  %v2491_v46 = vpop.f32.mrb[54].mxu0  ;;  %1224 = vst.msk [vmem:[%s3187_s24 + $0xb0] sm:$0xff] %vm1201_vm2, %v1163_v61 }
 0x2f3   : > { %2778 = vtanh.f32 %v1377_v41  ;;  %v1166_v47 = vadd.f32 %v2455_v45, %v3178_v55  ;;  %v1380_v48 = vadd.f32 %v2491_v46, %v3181_v56  ;;  %v1157_v49 = vpop.f32.mrb[55].mxu1  ;;  %v1371_v50 = vpop.f32.mrb[55].mxu0  ;;  %2516 = vmatprep.mubr.msk.bf16.mxu1 %vm991_vm1, %v1453_v58 }
 0x2f4   : > { %1222 = vst.msk [vmem:[%s3187_s24 + $0xa0] sm:$0xff] %vm1201_vm2, %v1155_v62  ;;  %2780 = vtanh.f32 %v1369_v44  ;;  %v1158_v51 = vadd.f32 %v1157_v49, %v3178_v55  ;;  %v1372_v52 = vadd.f32 %v1371_v50, %v3181_v56  ;;  %2517 = vmatmul.mubr.msk.bf16.gmra.mrb[80].mxu1 %vm991_vm1, %v1454_v40 }
 0x2f5   : > { %v2771_v53 = vpop.eup %2770  ;;  %1225 = vst.msk [vmem:[%s3187_s24 + $0xb8] sm:$0xff] %vm1201_vm2, %v1166_v47  ;;  %2782 = vtanh.f32 %v1380_v48  ;;  %v2609_v47 = vld [vmem:[%s3476_s6 + $0x18] sm:$0xff]   ;;  %v3340_v48 = vld [vmem:[%s3477_s7] sm:$0xff] }
 0x2f6   : > { %v2773_v54 = vpop.eup %2772  ;;  %1223 = vst.msk [vmem:[%s3187_s24 + $0xa8] sm:$0xff] %vm1201_vm2, %v1158_v51  ;;  %2784 = vtanh.f32 %v1372_v52  ;;  %2542 = vmatprep.subr.bf16.mxu0 %v2609_v47 }
 0x2f7   : > { %v2775_v3 = vpop.eup %2774  ;;  %v2458_v59 = vpop.f32.mrb[56].mxu1  ;;  %2543 = vmatpush3.bf16.msra.mxu0 %v2609_v47 }
 0x2f8   : > { %v2777_v57 = vpop.eup %2776  ;;  %v2494_v60 = vpop.f32.mrb[56].mxu0  ;;  %v1456_v63 = vpack.c.bf16 %v2775_v3, %v2771_v53  ;;  %v1179_v1 = vadd.f32 %v2458_v59, %v3178_v55 }
 0x2f9   : > { %v1393_v2 = vadd.f32 %v2494_v60, %v3181_v56  ;;  %v1170_v4 = vpop.f32.mrb[57].mxu1  ;;  %v1384_v5 = vpop.f32.mrb[57].mxu0  ;;  %v1455_v6 = vpack.c.bf16 %v2777_v57, %v2773_v54 }
 0x2fa   : > { %v1171_v7 = vadd.f32 %v1170_v4, %v3178_v55  ;;  %v1385_v8 = vadd.f32 %v1384_v5, %v3181_v56  ;;  %v2459_v9 = vpop.f32.mrb[58].mxu1  ;;  %v2495_v10 = vpop.f32.mrb[58].mxu0  ;;  %1228 = vst.msk [vmem:[%s3187_s24 + $0xd0] sm:$0xff] %vm1201_vm2, %v1179_v1 }
 0x2fb   : > { %2786 = vtanh.f32 %v1393_v2  ;;  %v1182_v11 = vadd.f32 %v2459_v9, %v3178_v55  ;;  %v1396_v12 = vadd.f32 %v2495_v10, %v3181_v56  ;;  %v1173_v13 = vpop.f32.mrb[59].mxu1  ;;  %v1387_v14 = vpop.f32.mrb[59].mxu0  ;;  %2520 = vmatprep.mubr.msk.bf16.mxu1 %vm991_vm1, %v1455_v6 }
 0x2fc   : > { %1226 = vst.msk [vmem:[%s3187_s24 + $0xc0] sm:$0xff] %vm1201_vm2, %v1171_v7  ;;  %2788 = vtanh.f32 %v1385_v8  ;;  %v1174_v15 = vadd.f32 %v1173_v13, %v3178_v55  ;;  %v1388_v16 = vadd.f32 %v1387_v14, %v3181_v56  ;;  %2521 = vmatmul.mubr.msk.bf16.gmra.mrb[84].mxu1 %vm991_vm1, %v1456_v63 }
 0x2fd   : > { %v2779_v17 = vpop.eup %2778  ;;  %1229 = vst.msk [vmem:[%s3187_s24 + $0xd8] sm:$0xff] %vm1201_vm2, %v1182_v11  ;;  %2790 = vtanh.f32 %v1396_v12 }
 0x2fe   : > { %v2781_v18 = vpop.eup %2780  ;;  %1227 = vst.msk [vmem:[%s3187_s24 + $0xc8] sm:$0xff] %vm1201_vm2, %v1174_v15  ;;  %2792 = vtanh.f32 %v1388_v16 }
 0x2ff   : > { %v2783_v19 = vpop.eup %2782  ;;  %v2462_v21 = vpop.f32.mrb[60].mxu1 }
 0x300   : > { %v2785_v20 = vpop.eup %2784  ;;  %v1458_v22 = vpack.c.bf16 %v2783_v19, %v2779_v17  ;;  %v1195_v23 = vadd.f32 %v2462_v21, %v3178_v55  ;;  %v1186_v24 = vpop.f32.mrb[61].mxu1 }
 0x301   : > { %v1457_v25 = vpack.c.bf16 %v2785_v20, %v2781_v18  ;;  %v1187_v26 = vadd.f32 %v1186_v24, %v3178_v55  ;;  %v2463_v27 = vpop.f32.mrb[62].mxu1 }
 0x302   : > { %1232 = vst.msk [vmem:[%s3187_s24 + $0xf0] sm:$0xff] %vm1201_vm2, %v1195_v23  ;;  %v1198_v28 = vadd.f32 %v2463_v27, %v3178_v55  ;;  %v1189_v29 = vpop.f32.mrb[63].mxu1 }
 0x303   : > { %2524 = vmatprep.mubr.msk.bf16.mxu1 %vm991_vm1, %v1457_v25  ;;  %1230 = vst.msk [vmem:[%s3187_s24 + $0xe0] sm:$0xff] %vm1201_vm2, %v1187_v26  ;;  %v1190_v30 = vadd.f32 %v1189_v29, %v3178_v55 }
 0x304   : > { %2525 = vmatmul.mubr.msk.bf16.gmra.mrb[88].mxu1 %vm991_vm1, %v1458_v22  ;;  %1233 = vst.msk [vmem:[%s3187_s24 + $0xf8] sm:$0xff] %vm1201_vm2, %v1198_v28 }
 0x305   : > { %v2787_v31 = vpop.eup %2786  ;;  %1231 = vst.msk [vmem:[%s3187_s24 + $0xe8] sm:$0xff] %vm1201_vm2, %v1190_v30 }
 0x306   : > { %v2789_v32 = vpop.eup %2788 }
 0x307   : > { %v2791_v33 = vpop.eup %2790  ;;  %v2498_v35 = vpop.f32.mrb[64].mxu1 }
 0x308   : > { %v2793_v34 = vpop.eup %2792  ;;  %v1460_v36 = vpack.c.bf16 %v2791_v33, %v2787_v31  ;;  %v1409_v37 = vadd.f32 %v2498_v35, %v3181_v56  ;;  %v1400_v38 = vpop.f32.mrb[65].mxu1 }
 0x309   : > { %v1459_v39 = vpack.c.bf16 %v2793_v34, %v2789_v32  ;;  %v1401_v40 = vadd.f32 %v1400_v38, %v3181_v56  ;;  %v2499_v61 = vpop.f32.mrb[66].mxu1 }
 0x30a   : > { %2794 = vtanh.f32 %v1409_v37  ;;  %v1412_v55 = vadd.f32 %v2499_v61, %v3181_v56  ;;  %v1403_v41 = vpop.f32.mrb[67].mxu1 }
 0x30b   : > { %2528 = vmatprep.mubr.msk.bf16.mxu1 %vm991_vm1, %v1459_v39  ;;  %2796 = vtanh.f32 %v1401_v40  ;;  %v1404_v42 = vadd.f32 %v1403_v41, %v3181_v56  ;;  %v1469_v56 = vsub.s32 3, %v3026_v0 }
 0x30c   : > { %2529 = vmatmul.mubr.msk.bf16.gmra.mrb[92].mxu1 %vm991_vm1, %v1460_v36  ;;  %2798 = vtanh.f32 %v1412_v55 }
 0x30d   : > { %2800 = vtanh.f32 %v1404_v42  ;;  %v3343_v49 = vrot.slane %v3340_v48, %v1469_v56 }
 0x314   : > { %v2795_v43 = vpop.eup %2794 }
 0x315   : > { %v2797_v58 = vpop.eup %2796 }
 0x316   : > { %v2799_v62 = vpop.eup %2798 }
 0x317   : > { %v2801_v44 = vpop.eup %2800  ;;  %v1462_v45 = vpack.c.bf16 %v2799_v62, %v2795_v43 }
 0x318   : > { %v1461_v46 = vpack.c.bf16 %v2801_v44, %v2797_v58 }
 0x31a   : > { %2532 = vmatprep.mubr.msk.bf16.mxu1 %vm991_vm1, %v1461_v46 }
 0x31b   : > { %2533 = vmatmul.mubr.msk.bf16.gmra.mrb[96].mxu1 %vm991_vm1, %v1462_v45 }
 0x3ae   : > { %v2506_v50 = vpop.f32.mrb[68].mxu1 }
 0x3af   : > { %v1574_v51 = vadd.f32 %v2506_v50, %v3343_v49  ;;  %v1565_v52 = vpop.f32.mrb[69].mxu1 }
 0x3b0   : > { %v1566_v53 = vadd.f32 %v1565_v52, %v3343_v49  ;;  %v2507_v54 = vpop.f32.mrb[70].mxu1 }
 0x3b1   : > { %2802 = vtanh.f32 %v1574_v51  ;;  %v1577_v3 = vadd.f32 %v2507_v54, %v3343_v49  ;;  %v1568_v57 = vpop.f32.mrb[71].mxu1 }
 0x3b2   : > { %2804 = vtanh.f32 %v1566_v53  ;;  %v1569_v59 = vadd.f32 %v1568_v57, %v3343_v49 }
 0x3b3   : > { %2806 = vtanh.f32 %v1577_v3 }
 0x3b4   : > { %2808 = vtanh.f32 %v1569_v59 }
 0x3b6   : > { %v2510_v60 = vpop.f32.mrb[72].mxu1 }
 0x3b7   : > { %v1590_v63 = vadd.f32 %v2510_v60, %v3343_v49  ;;  %v1581_v1 = vpop.f32.mrb[73].mxu1 }
 0x3b8   : > { %v1582_v2 = vadd.f32 %v1581_v1, %v3343_v49  ;;  %v2511_v4 = vpop.f32.mrb[74].mxu1 }
 0x3b9   : > { %2810 = vtanh.f32 %v1590_v63  ;;  %v1593_v5 = vadd.f32 %v2511_v4, %v3343_v49  ;;  %v1584_v6 = vpop.f32.mrb[75].mxu1 }
 0x3ba   : > { %2812 = vtanh.f32 %v1582_v2  ;;  %v1585_v7 = vadd.f32 %v1584_v6, %v3343_v49 }
 0x3bb   : > { %v2803_v8 = vpop.eup %2802  ;;  %2814 = vtanh.f32 %v1593_v5 }
 0x3bc   : > { %v2805_v9 = vpop.eup %2804  ;;  %2816 = vtanh.f32 %v1585_v7 }
 0x3bd   : > { %v2807_v10 = vpop.eup %2806 }
 0x3be   : > { %v2809_v11 = vpop.eup %2808  ;;  %v1725_v12 = vpack.c.bf16 %v2807_v10, %v2803_v8 }
 0x3bf   : > { %v2514_v13 = vpop.f32.mrb[76].mxu1  ;;  %v1724_v16 = vpack.c.bf16 %v2809_v11, %v2805_v9 }
 0x3c0   : > { %v1606_v14 = vadd.f32 %v2514_v13, %v3343_v49  ;;  %v1597_v15 = vpop.f32.mrb[77].mxu1 }
 0x3c1   : > { %v1598_v17 = vadd.f32 %v1597_v15, %v3343_v49  ;;  %v2515_v18 = vpop.f32.mrb[78].mxu1  ;;  %2544 = vmatprep.mubr.msk.bf16.mxu0 %vm713_vm0, %v1724_v16 }
 0x3c2   : > { %2818 = vtanh.f32 %v1606_v14  ;;  %v1609_v19 = vadd.f32 %v2515_v18, %v3343_v49  ;;  %v1600_v20 = vpop.f32.mrb[79].mxu1  ;;  %2545 = vmatmul.mubr.msk.bf16.vlgmr.msra.gmra.mrb[60].mxu0 %vm713_vm0, %v1725_v12 }
 0x3c3   : > { %2820 = vtanh.f32 %v1598_v17  ;;  %v1601_v21 = vadd.f32 %v1600_v20, %v3343_v49  ;;  %v2811_v22 = vpop.eup %2810 }
 0x3c4   : > { %2822 = vtanh.f32 %v1609_v19  ;;  %v2813_v23 = vpop.eup %2812 }
 0x3c5   : > { %2824 = vtanh.f32 %v1601_v21  ;;  %v2815_v24 = vpop.eup %2814 }
 0x3c6   : > { %v2817_v25 = vpop.eup %2816  ;;  %v1727_v27 = vpack.c.bf16 %v2815_v24, %v2811_v22 }
 0x3c7   : > { %v2518_v26 = vpop.f32.mrb[80].mxu1  ;;  %v1726_v30 = vpack.c.bf16 %v2817_v25, %v2813_v23 }
 0x3c8   : > { %v1622_v28 = vadd.f32 %v2518_v26, %v3343_v49  ;;  %v1613_v29 = vpop.f32.mrb[81].mxu1 }
 0x3c9   : > { %v1614_v31 = vadd.f32 %v1613_v29, %v3343_v49  ;;  %v2519_v32 = vpop.f32.mrb[82].mxu1  ;;  %2548 = vmatprep.mubr.msk.bf16.mxu0 %vm713_vm0, %v1726_v30 }
 0x3ca   : > { %2826 = vtanh.f32 %v1622_v28  ;;  %v1625_v33 = vadd.f32 %v2519_v32, %v3343_v49  ;;  %v1616_v34 = vpop.f32.mrb[83].mxu1  ;;  %2549 = vmatmul.mubr.msk.bf16.gmra.mrb[64].mxu0 %vm713_vm0, %v1727_v27 }
 0x3cb   : > { %2828 = vtanh.f32 %v1614_v31  ;;  %v1617_v35 = vadd.f32 %v1616_v34, %v3343_v49 }
 0x3cc   : > { %v2819_v36 = vpop.eup %2818  ;;  %2830 = vtanh.f32 %v1625_v33 }
 0x3cd   : > { %v2821_v37 = vpop.eup %2820  ;;  %2832 = vtanh.f32 %v1617_v35 }
 0x3ce   : > { %v2823_v38 = vpop.eup %2822 }
 0x3cf   : > { %v2825_v39 = vpop.eup %2824  ;;  %v2522_v40 = vpop.f32.mrb[84].mxu1  ;;  %v1729_v61 = vpack.c.bf16 %v2823_v38, %v2819_v36 }
 0x3d0   : > { %v1638_v55 = vadd.f32 %v2522_v40, %v3343_v49  ;;  %v1629_v41 = vpop.f32.mrb[85].mxu1  ;;  %v1728_v42 = vpack.c.bf16 %v2825_v39, %v2821_v37 }
 0x3d1   : > { %v1630_v43 = vadd.f32 %v1629_v41, %v3343_v49  ;;  %v2523_v58 = vpop.f32.mrb[86].mxu1  ;;  %v1750_v41 = vsub.s32 4, %v3026_v0 }
 0x3d2   : > { %2834 = vtanh.f32 %v1638_v55  ;;  %v1641_v62 = vadd.f32 %v2523_v58, %v3343_v49  ;;  %v1632_v44 = vpop.f32.mrb[87].mxu1  ;;  %2552 = vmatprep.mubr.msk.bf16.mxu0 %vm713_vm0, %v1728_v42 }
 0x3d3   : > { %2836 = vtanh.f32 %v1630_v43  ;;  %v1633_v45 = vadd.f32 %v1632_v44, %v3343_v49  ;;  %2553 = vmatmul.mubr.msk.bf16.gmra.mrb[68].mxu0 %vm713_vm0, %v1729_v61  ;;  %v3395_v42 = vrot.slane %v3340_v48, %v1750_v41 }
 0x3d4   : > { %v2827_v46 = vpop.eup %2826  ;;  %2838 = vtanh.f32 %v1641_v62 }
 0x3d5   : > { %v2829_v47 = vpop.eup %2828  ;;  %2840 = vtanh.f32 %v1633_v45 }
 0x3d6   : > { %v2831_v56 = vpop.eup %2830 }
 0x3d7   : > { %v2833_v50 = vpop.eup %2832  ;;  %v2526_v51 = vpop.f32.mrb[88].mxu1  ;;  %v1731_v52 = vpack.c.bf16 %v2831_v56, %v2827_v46 }
 0x3d8   : > { %v1654_v53 = vadd.f32 %v2526_v51, %v3343_v49  ;;  %v1645_v54 = vpop.f32.mrb[89].mxu1  ;;  %v1730_v3 = vpack.c.bf16 %v2833_v50, %v2829_v47 }
 0x3d9   : > { %v1646_v57 = vadd.f32 %v1645_v54, %v3343_v49  ;;  %v2527_v59 = vpop.f32.mrb[90].mxu1 }
 0x3da   : > { %2842 = vtanh.f32 %v1654_v53  ;;  %v1657_v60 = vadd.f32 %v2527_v59, %v3343_v49  ;;  %v1648_v63 = vpop.f32.mrb[91].mxu1  ;;  %2556 = vmatprep.mubr.msk.bf16.mxu0 %vm713_vm0, %v1730_v3 }
 0x3db   : > { %2844 = vtanh.f32 %v1646_v57  ;;  %v1649_v1 = vadd.f32 %v1648_v63, %v3343_v49  ;;  %2557 = vmatmul.mubr.msk.bf16.gmra.mrb[72].mxu0 %vm713_vm0, %v1731_v52 }
 0x3dc   : > { %v2835_v2 = vpop.eup %2834  ;;  %2846 = vtanh.f32 %v1657_v60 }
 0x3dd   : > { %v2837_v4 = vpop.eup %2836  ;;  %2848 = vtanh.f32 %v1649_v1 }
 0x3de   : > { %v2839_v5 = vpop.eup %2838 }
 0x3df   : > { %v2841_v6 = vpop.eup %2840  ;;  %v2530_v7 = vpop.f32.mrb[92].mxu1  ;;  %v1733_v8 = vpack.c.bf16 %v2839_v5, %v2835_v2 }
 0x3e0   : > { %v1670_v9 = vadd.f32 %v2530_v7, %v3343_v49  ;;  %v1661_v10 = vpop.f32.mrb[93].mxu1  ;;  %v1732_v11 = vpack.c.bf16 %v2841_v6, %v2837_v4 }
 0x3e1   : > { %v1662_v12 = vadd.f32 %v1661_v10, %v3343_v49  ;;  %v2531_v13 = vpop.f32.mrb[94].mxu1 }
 0x3e2   : > { %2850 = vtanh.f32 %v1670_v9  ;;  %v1673_v14 = vadd.f32 %v2531_v13, %v3343_v49  ;;  %v1664_v15 = vpop.f32.mrb[95].mxu1  ;;  %2560 = vmatprep.mubr.msk.bf16.mxu0 %vm713_vm0, %v1732_v11 }
 0x3e3   : > { %2852 = vtanh.f32 %v1662_v12  ;;  %v1665_v16 = vadd.f32 %v1664_v15, %v3343_v49  ;;  %2561 = vmatmul.mubr.msk.bf16.gmra.mrb[76].mxu0 %vm713_vm0, %v1733_v8 }
 0x3e4   : > { %v2843_v17 = vpop.eup %2842  ;;  %2854 = vtanh.f32 %v1673_v14 }
 0x3e5   : > { %v2845_v18 = vpop.eup %2844  ;;  %2856 = vtanh.f32 %v1665_v16 }
 0x3e6   : > { %v2847_v19 = vpop.eup %2846 }
 0x3e7   : > { %v2849_v20 = vpop.eup %2848  ;;  %v1735_v21 = vpack.c.bf16 %v2847_v19, %v2843_v17 }
 0x3e8   : > { %v1734_v22 = vpack.c.bf16 %v2849_v20, %v2845_v18 }
 0x3ea   : > { %2564 = vmatprep.mubr.msk.bf16.mxu0 %vm713_vm0, %v1734_v22 }
 0x3eb   : > { %2565 = vmatmul.mubr.msk.bf16.gmra.mrb[80].mxu0 %vm713_vm0, %v1735_v21 }
 0x3ec   : > { %v2851_v23 = vpop.eup %2850 }
 0x3ed   : > { %v2853_v24 = vpop.eup %2852 }
 0x3ee   : > { %v2855_v25 = vpop.eup %2854  ;;  %v2534_v27 = vpop.f32.mrb[96].mxu1 }
 0x3ef   : > { %v2857_v26 = vpop.eup %2856  ;;  %v1737_v28 = vpack.c.bf16 %v2855_v25, %v2851_v23  ;;  %v1686_v29 = vadd.f32 %v2534_v27, %v3343_v49  ;;  %v1677_v30 = vpop.f32.mrb[97].mxu1 }
 0x3f0   : > { %v1736_v31 = vpack.c.bf16 %v2857_v26, %v2853_v24  ;;  %v1678_v32 = vadd.f32 %v1677_v30, %v3343_v49  ;;  %v2535_v33 = vpop.f32.mrb[98].mxu1 }
 0x3f1   : > { %2858 = vtanh.f32 %v1686_v29  ;;  %v1689_v34 = vadd.f32 %v2535_v33, %v3343_v49  ;;  %v1680_v35 = vpop.f32.mrb[99].mxu1 }
 0x3f2   : > { %2568 = vmatprep.mubr.msk.bf16.mxu0 %vm713_vm0, %v1736_v31  ;;  %2860 = vtanh.f32 %v1678_v32  ;;  %v1681_v36 = vadd.f32 %v1680_v35, %v3343_v49 }
 0x3f3   : > { %2569 = vmatmul.mubr.msk.bf16.gmra.mrb[84].mxu0 %vm713_vm0, %v1737_v28  ;;  %2862 = vtanh.f32 %v1689_v34 }
 0x3f4   : > { %2864 = vtanh.f32 %v1681_v36 }
 0x3fb   : > { %v2859_v37 = vpop.eup %2858 }
 0x3fc   : > { %v2861_v38 = vpop.eup %2860 }
 0x3fd   : > { %v2863_v39 = vpop.eup %2862 }
 0x3fe   : > { %v2865_v40 = vpop.eup %2864  ;;  %v1739_v61 = vpack.c.bf16 %v2863_v39, %v2859_v37 }
 0x3ff   : > { %v1738_v55 = vpack.c.bf16 %v2865_v40, %v2861_v38 }
 0x401   : > { %2572 = vmatprep.mubr.msk.bf16.mxu0 %vm713_vm0, %v1738_v55 }
 0x402   : > { %2573 = vmatmul.mubr.msk.bf16.gmra.mrb[88].mxu0 %vm713_vm0, %v1739_v61 }
 0x495   : > { %v2546_v49 = vpop.f32.mrb[60].mxu0 }
 0x496   : > { %v1867_v43 = vadd.f32 %v2546_v49, %v3395_v42  ;;  %v1858_v58 = vpop.f32.mrb[61].mxu0 }
 0x497   : > { %v1859_v62 = vadd.f32 %v1858_v58, %v3395_v42  ;;  %v2547_v0 = vpop.f32.mrb[62].mxu0 }
 0x498   : > { %1987 = vst [vmem:[%s3401_s11 + $0x10] sm:$0xff] %v1867_v43  ;;  %v1870_v48 = vadd.f32 %v2547_v0, %v3395_v42  ;;  %v1861_v44 = vpop.f32.mrb[63].mxu0 }
 0x499   : > { %1985 = vst [vmem:[%s3401_s11] sm:$0xff] %v1859_v62  ;;  %v1862_v45 = vadd.f32 %v1861_v44, %v3395_v42 }
 0x49a   : > { %1988 = vst [vmem:[%s3401_s11 + $0x18] sm:$0xff] %v1870_v48 }
 0x49b   : > { %1986 = vst [vmem:[%s3401_s11 + $0x8] sm:$0xff] %v1862_v45 }
 0x49d   : > { %v2550_v46 = vpop.f32.mrb[64].mxu0 }
 0x49e   : > { %v1883_v47 = vadd.f32 %v2550_v46, %v3395_v42  ;;  %v1874_v56 = vpop.f32.mrb[65].mxu0 }
 0x49f   : > { %v1875_v50 = vadd.f32 %v1874_v56, %v3395_v42  ;;  %v2551_v51 = vpop.f32.mrb[66].mxu0 }
 0x4a0   : > { %1991 = vst [vmem:[%s3401_s11 + $0x30] sm:$0xff] %v1883_v47  ;;  %v1886_v52 = vadd.f32 %v2551_v51, %v3395_v42  ;;  %v1877_v53 = vpop.f32.mrb[67].mxu0 }
 0x4a1   : > { %1989 = vst [vmem:[%s3401_s11 + $0x20] sm:$0xff] %v1875_v50  ;;  %v1878_v54 = vadd.f32 %v1877_v53, %v3395_v42 }
 0x4a2   : > { %1992 = vst [vmem:[%s3401_s11 + $0x38] sm:$0xff] %v1886_v52 }
 0x4a3   : > { %1990 = vst [vmem:[%s3401_s11 + $0x28] sm:$0xff] %v1878_v54 }
 0x4a6   : > { %v2554_v3 = vpop.f32.mrb[68].mxu0 }
 0x4a7   : > { %v1899_v57 = vadd.f32 %v2554_v3, %v3395_v42  ;;  %v1890_v59 = vpop.f32.mrb[69].mxu0 }
 0x4a8   : > { %v1891_v60 = vadd.f32 %v1890_v59, %v3395_v42  ;;  %v2555_v63 = vpop.f32.mrb[70].mxu0 }
 0x4a9   : > { %1995 = vst [vmem:[%s3401_s11 + $0x50] sm:$0xff] %v1899_v57  ;;  %v1902_v1 = vadd.f32 %v2555_v63, %v3395_v42  ;;  %v1893_v2 = vpop.f32.mrb[71].mxu0 }
 0x4aa   : > { %1993 = vst [vmem:[%s3401_s11 + $0x40] sm:$0xff] %v1891_v60  ;;  %v1894_v4 = vadd.f32 %v1893_v2, %v3395_v42 }
 0x4ab   : > { %1996 = vst [vmem:[%s3401_s11 + $0x58] sm:$0xff] %v1902_v1 }
 0x4ac   : > { %1994 = vst [vmem:[%s3401_s11 + $0x48] sm:$0xff] %v1894_v4 }
 0x4ae   : > { %v2558_v5 = vpop.f32.mrb[72].mxu0 }
 0x4af   : > { %v1915_v6 = vadd.f32 %v2558_v5, %v3395_v42  ;;  %v1906_v7 = vpop.f32.mrb[73].mxu0 }
 0x4b0   : > { %v1907_v8 = vadd.f32 %v1906_v7, %v3395_v42  ;;  %v2559_v9 = vpop.f32.mrb[74].mxu0 }
 0x4b1   : > { %1999 = vst [vmem:[%s3401_s11 + $0x70] sm:$0xff] %v1915_v6  ;;  %v1918_v10 = vadd.f32 %v2559_v9, %v3395_v42  ;;  %v1909_v11 = vpop.f32.mrb[75].mxu0 }
 0x4b2   : > { %1997 = vst [vmem:[%s3401_s11 + $0x60] sm:$0xff] %v1907_v8  ;;  %v1910_v12 = vadd.f32 %v1909_v11, %v3395_v42 }
 0x4b3   : > { %2000 = vst [vmem:[%s3401_s11 + $0x78] sm:$0xff] %v1918_v10 }
 0x4b4   : > { %1998 = vst [vmem:[%s3401_s11 + $0x68] sm:$0xff] %v1910_v12 }
 0x4b6   : > { %v2562_v13 = vpop.f32.mrb[76].mxu0 }
 0x4b7   : > { %v1931_v14 = vadd.f32 %v2562_v13, %v3395_v42  ;;  %v1922_v15 = vpop.f32.mrb[77].mxu0 }
 0x4b8   : > { %v1923_v16 = vadd.f32 %v1922_v15, %v3395_v42  ;;  %v2563_v17 = vpop.f32.mrb[78].mxu0 }
 0x4b9   : > { %2003 = vst [vmem:[%s3401_s11 + $0x90] sm:$0xff] %v1931_v14  ;;  %v1934_v18 = vadd.f32 %v2563_v17, %v3395_v42  ;;  %v1925_v19 = vpop.f32.mrb[79].mxu0 }
 0x4ba   : > { %2001 = vst [vmem:[%s3401_s11 + $0x80] sm:$0xff] %v1923_v16  ;;  %v1926_v20 = vadd.f32 %v1925_v19, %v3395_v42 }
 0x4bb   : > { %2004 = vst [vmem:[%s3401_s11 + $0x98] sm:$0xff] %v1934_v18 }
 0x4bc   : > { %2002 = vst [vmem:[%s3401_s11 + $0x88] sm:$0xff] %v1926_v20 }
 0x4be   : > { %v2566_v21 = vpop.f32.mrb[80].mxu0 }
 0x4bf   : > { %v1947_v22 = vadd.f32 %v2566_v21, %v3395_v42  ;;  %v1938_v23 = vpop.f32.mrb[81].mxu0 }
 0x4c0   : > { %v1939_v24 = vadd.f32 %v1938_v23, %v3395_v42  ;;  %v2567_v25 = vpop.f32.mrb[82].mxu0 }
 0x4c1   : > { %2007 = vst [vmem:[%s3401_s11 + $0xb0] sm:$0xff] %v1947_v22  ;;  %v1950_v26 = vadd.f32 %v2567_v25, %v3395_v42  ;;  %v1941_v27 = vpop.f32.mrb[83].mxu0 }
 0x4c2   : > { %2005 = vst [vmem:[%s3401_s11 + $0xa0] sm:$0xff] %v1939_v24  ;;  %v1942_v28 = vadd.f32 %v1941_v27, %v3395_v42 }
 0x4c3   : > { %2008 = vst [vmem:[%s3401_s11 + $0xb8] sm:$0xff] %v1950_v26 }
 0x4c4   : > { %2006 = vst [vmem:[%s3401_s11 + $0xa8] sm:$0xff] %v1942_v28 }
 0x4c6   : > { %v2570_v29 = vpop.f32.mrb[84].mxu0 }
 0x4c7   : > { %v1963_v30 = vadd.f32 %v2570_v29, %v3395_v42  ;;  %v1954_v31 = vpop.f32.mrb[85].mxu0 }
 0x4c8   : > { %v1955_v32 = vadd.f32 %v1954_v31, %v3395_v42  ;;  %v2571_v33 = vpop.f32.mrb[86].mxu0 }
 0x4c9   : > { %2011 = vst [vmem:[%s3401_s11 + $0xd0] sm:$0xff] %v1963_v30  ;;  %v1966_v34 = vadd.f32 %v2571_v33, %v3395_v42  ;;  %v1957_v35 = vpop.f32.mrb[87].mxu0 }
 0x4ca   : > { %2009 = vst [vmem:[%s3401_s11 + $0xc0] sm:$0xff] %v1955_v32  ;;  %v1958_v36 = vadd.f32 %v1957_v35, %v3395_v42 }
 0x4cb   : > { %2012 = vst [vmem:[%s3401_s11 + $0xd8] sm:$0xff] %v1966_v34 }
 0x4cc   : > { %2010 = vst [vmem:[%s3401_s11 + $0xc8] sm:$0xff] %v1958_v36 }
 0x4d5   : > { %v2574_v37 = vpop.f32.mrb[88].mxu0 }
 0x4d6   : > { %v1979_v38 = vadd.f32 %v2574_v37, %v3395_v42  ;;  %v1970_v39 = vpop.f32.mrb[89].mxu0 }
 0x4d7   : > { %v1971_v40 = vadd.f32 %v1970_v39, %v3395_v42  ;;  %v2575_v61 = vpop.f32.mrb[90].mxu0 }
 0x4d8   : > { %2015 = vst [vmem:[%s3401_s11 + $0xf0] sm:$0xff] %v1979_v38  ;;  %v1982_v55 = vadd.f32 %v2575_v61, %v3395_v42  ;;  %v1973_v41 = vpop.f32.mrb[91].mxu0 }
 0x4d9   : > { %2013 = vst [vmem:[%s3401_s11 + $0xe0] sm:$0xff] %v1971_v40  ;;  %v1974_v49 = vadd.f32 %v1973_v41, %v3395_v42 }
 0x4da   : > { %2016 = vst [vmem:[%s3401_s11 + $0xf8] sm:$0xff] %v1982_v55 }
 0x4db   : > { %2014 = vst [vmem:[%s3401_s11 + $0xe8] sm:$0xff] %v1974_v49 }
 0x4dc PF: > { %s20_s30 = sadd.s32 1, %s2873_s30  }
 0x4dd   : > { %p17_p4 = scmp.ge.s32.totalorder %s20_s30, 6  }
 0x4df   :  { %19 = sbr.rel (!%p17_p4) target bundleno = 1 (0x1), region = 94 }

</bundles_post_ra>
